<compile_context>
chip_gen: v7x
topology: tpu7x:2x2x1
jax: 0.10.0
libtpu: 0.0.40
codegen_flags: <defaults>
</compile_context>

<pallas_src>
import functools

import jax
import jax.numpy as jnp
from jax import lax
from jax.experimental import pallas as pl
from jax.experimental.pallas import tpu as pltpu


def _block2d_kernel(x_ref, w_ref, b_ref, a_ref, o_ref, *, K, TD, H, WpC, WCo):
    """One (batch, depth-block) grid step.

    x_ref : (D, Hp, Wp*C)        padded channels-last input, whole depth range (resident)
    w_ref : (K*K, Wp*C, W*C_out) banded weights, one slab per (kd, kh) tap
    b_ref : (1, W*C_out)         conv bias tiled over W (lane-dense)
    a_ref : (1, 1)               PReLU slope (nn.PReLU() default: a single shared scalar)
    o_ref : (TD, H, W*C_out)     lane-dense output block
    """
    d0 = pl.program_id(1) * TD            # first output depth of this block

    def body_kd(kd, acc):                  # kd dynamic (fori_loop), kh static
        for kh in range(K):
            slab = x_ref[pl.ds(d0 + kd, TD), kh:kh + H, :]       # (TD, H, Wp*C)
            slab = slab.reshape(TD * H, WpC)                     # row-merge only
            acc = acc + jnp.dot(slab, w_ref[kd * K + kh],
                                preferred_element_type=jnp.float32)
        return acc

    acc = lax.fori_loop(0, K, body_kd,
                        jnp.zeros((TD * H, WCo), jnp.float32), unroll=True)

    acc = acc + b_ref[...]                                        # (1, WCo) broadcast
    alpha = a_ref[0, 0]
    y = jnp.maximum(acc, 0.0) + alpha * jnp.minimum(acc, 0.0)     # PReLU (f32 VPU)
    o_ref[...] = y.reshape(TD, H, WCo).astype(o_ref.dtype)        # one lane-dense store


def _choose_depth_block(B, D_out, min_steps=4):
    """Largest divisor of D_out that still yields >= min_steps total grid steps
    (keeps both v7x TensorCores busy); falls back to whole-depth blocks."""
    best = None
    for td in range(1, D_out + 1):
        if D_out % td == 0 and B * (D_out // td) >= min_steps:
            best = td
    return best if best is not None else D_out


def block2d_forward(x, conv_w, conv_b, prelu_a, *,
                    compute_dtype=jnp.float32, channels_last_out=False):
    """Block2d forward.  x: (B, C, D, H, W) -> (B, C//2, D-K+1, H, W)."""
    B, C, D, H, W = x.shape
    C_out, C_in, Kd, Kh, Kw = conv_w.shape
    assert C_in == C and Kd == Kh == Kw, "cubic conv kernel expected"
    K = Kh
    P = K // 2                              # module uses padding=[0, 1, 1]
    D_out = D - K + 1
    Hp, Wp = H + 2 * P, W + 2 * P
    WpC = Wp * C
    WCo = W * C_out
    TD = _choose_depth_block(B, D_out)

    # ----- wrapper-side layout plumbing (plain JAX glue, no im2col expansion) -----
    # NCDHW -> channels-last, zero-pad H/W (depth unpadded), fold (W, C) into lanes.
    x_cl = jnp.transpose(x, (0, 2, 3, 4, 1))                       # (B, D, H, W, C)
    x_pad = jnp.pad(x_cl, ((0, 0), (0, 0), (P, P), (P, P), (0, 0)))
    x_in = x_pad.reshape(B, D, Hp, WpC).astype(compute_dtype)      # (B, D, Hp, Wp*C)

    # Banded weights: for each (kd, kh) tap build M[(wp, ci), (w, co)] =
    #   conv_w[co, ci, kd, kh, wp - w] if 0 <= wp - w < K else 0.
    w_taps = jnp.transpose(conv_w, (2, 3, 4, 1, 0)).astype(jnp.float32)   # (kd,kh,kw,ci,co)
    shifts = jnp.stack([jnp.eye(Wp, W, k=-kw, dtype=jnp.float32)
                        for kw in range(K)])                               # (kw, wp, w)
    w_band = jnp.einsum('kpw,dhkio->dhpiwo', shifts, w_taps)               # (kd,kh,wp,ci,w,co)
    w_band = w_band.reshape(K * K, WpC, WCo).astype(compute_dtype)

    b_row = jnp.tile(conv_b.astype(jnp.float32), W).reshape(1, WCo)        # bias tiled over W
    a_arr = jnp.asarray(prelu_a, dtype=jnp.float32).reshape(1, 1)

    # VMEM budget: resident input block + double-buffered output + banded weights.
    itemsize = jnp.dtype(compute_dtype).itemsize
    vmem_need = (2 * D * Hp * WpC * itemsize
                 + 2 * TD * H * WCo * jnp.dtype(x.dtype).itemsize
                 + 2 * K * K * WpC * WCo * itemsize + (2 << 20))
    vmem_limit = int(min(max(vmem_need, 32 << 20), 100 << 20))
    # TODO(synk): for volumes whose padded per-batch slab exceeds ~24 MiB (v7x 64 MiB VMEM),
    # switch the x in_spec to overlapping depth windows instead of the full-depth block.

    out = pl.pallas_call(
        functools.partial(_block2d_kernel, K=K, TD=TD, H=H, WpC=WpC, WCo=WCo),
        out_shape=jax.ShapeDtypeStruct((B, D_out, H, WCo), x.dtype),
        grid_spec=pltpu.PrefetchScalarGridSpec(
            num_scalar_prefetch=0,
            grid=(B, D_out // TD),
            in_specs=[
                # Full padded depth range per batch; index ignores the depth-block axis,
                # so Pallas keeps it resident (no re-fetch) across a batch's TD-blocks.
                pl.BlockSpec((None, D, Hp, WpC), lambda b, j: (b, 0, 0, 0)),
                pl.BlockSpec((K * K, WpC, WCo), lambda b, j: (0, 0, 0)),   # banded weights
                pl.BlockSpec((1, WCo), lambda b, j: (0, 0)),               # bias row
                pl.BlockSpec((1, 1), lambda b, j: (0, 0)),                 # PReLU slope
            ],
            out_specs=pl.BlockSpec((None, TD, H, WCo), lambda b, j: (b, j, 0, 0)),
        ),
        compiler_params=pltpu.CompilerParams(
            dimension_semantics=("parallel", "parallel"),
            vmem_limit_bytes=vmem_limit),
    )(x_in, w_band, b_row, a_arr)

    out = out.reshape(B, D_out, H, W, C_out)
    if channels_last_out:
        return out                                    # (B, D_out, H, W, C_out), no HBM transpose
    return jnp.transpose(out, (0, 4, 1, 2, 3))        # NCDHW to match the PyTorch module


def _reference(x, conv_w, conv_b, prelu_a):
    """Pure-JAX reference matching the PyTorch Block2d forward."""
    K = conv_w.shape[-1]
    P = K // 2
    y = lax.conv_general_dilated(
        x, conv_w, window_strides=(1, 1, 1),
        padding=((0, 0), (P, P), (P, P)),
        dimension_numbers=("NCDHW", "OIDHW", "NCDHW"),
        precision=lax.Precision.HIGHEST)
    y = y + conv_b.reshape(1, -1, 1, 1, 1)
    return jnp.maximum(y, 0.0) + prelu_a * jnp.minimum(y, 0.0)    # PReLU (scalar slope)


if __name__ == "__main__":
    B, n_feats, D, H, W = 2, 16, 8, 16, 16
    kernel_size = 3
    C_out = n_feats // 2

    key = jax.random.PRNGKey(0)
    kx, kwt, kb = jax.random.split(key, 3)

    x = jax.random.normal(kx, (B, n_feats, D, H, W), dtype=jnp.float32)
    fan_in = n_feats * kernel_size ** 3
    std = (2.0 / fan_in) ** 0.5
    conv_w = jax.random.normal(
        kwt, (C_out, n_feats, kernel_size, kernel_size, kernel_size),
        dtype=jnp.float32) * std
    conv_b = jax.random.normal(kb, (C_out,), dtype=jnp.float32) * 0.01
    prelu_a = jnp.float32(0.25)            # nn.PReLU() default init (single shared slope)

    ref = jax.block_until_ready(_reference(x, conv_w, conv_b, prelu_a))

    # Strict-accuracy path (f32 streamed inputs).
    fwd_f32 = jax.jit(functools.partial(block2d_forward, compute_dtype=jnp.float32))
    out = jax.block_until_ready(fwd_f32(x, conv_w, conv_b, prelu_a))
    assert out.shape == (B, C_out, D - kernel_size + 1, H, W)
    assert jnp.allclose(out, ref, atol=1e-3, rtol=1e-3), "f32 path mismatch vs reference"

    # Bandwidth-saving path for v5e/v6e: bf16 streamed inputs/weights, f32 accumulate.
    fwd_bf16 = jax.jit(functools.partial(block2d_forward, compute_dtype=jnp.bfloat16))
    out_bf = jax.block_until_ready(fwd_bf16(x, conv_w, conv_b, prelu_a))
    assert jnp.allclose(out_bf, ref, atol=5e-2, rtol=5e-2), "bf16 path mismatch vs reference"

    print("KERNEL_OK")
</pallas_src>

<mosaic_0001>
module attributes {stable_mosaic.version = 11 : i64} {
  func.func @_block2d_kernel(%arg0: i32, %arg1: i32, %arg2: memref<1x8x18x288xf32, #tpu.memory_space<vmem>>, %arg3: memref<9x288x128xf32, #tpu.memory_space<vmem>>, %arg4: memref<1x128xf32, #tpu.memory_space<vmem>>, %arg5: memref<1x1xf32, #tpu.memory_space<vmem>>, %arg6: memref<1x3x16x128xf32, #tpu.memory_space<vmem>>) attributes {dimension_semantics = [#tpu.dimension_semantics<parallel>, #tpu.dimension_semantics<parallel>], iteration_bounds = array<i64: 2, 2>, scalar_prefetch = 0 : i64, scratch_operands = 0 : i64, tpu.core_type = #tpu.core_type<tc>, window_params = [{transform_indices = @transform_0, window_bounds = array<i64: 1, 8, 18, 288>}, {pipeline_mode = #tpu.pipeline_mode<synchronous>, transform_indices = @transform_1, window_bounds = array<i64: 9, 288, 128>}, {pipeline_mode = #tpu.pipeline_mode<synchronous>, transform_indices = @transform_2, window_bounds = array<i64: 1, 128>}, {pipeline_mode = #tpu.pipeline_mode<synchronous>, transform_indices = @transform_3, window_bounds = array<i64: 1, 1>}, {transform_indices = @transform_4, window_bounds = array<i64: 1, 3, 16, 128>}]} {
    %c3_i32 = arith.constant 3 : i32
    %0 = arith.muli %arg1, %c3_i32 : i32
    %cst = arith.constant 0.000000e+00 : f32
    %1 = vector.broadcast %cst : f32 to vector<48x128xf32>
    %c0_i32 = arith.constant 0 : i32
    %2 = arith.addi %0, %c0_i32 : i32
    %c0 = arith.constant 0 : index
    %3 = arith.index_cast %2 : i32 to index
    %c0_0 = arith.constant 0 : index
    %c0_1 = arith.constant 0 : index
    %4 = vector.load %arg2[%c0, %3, %c0_0, %c0_1] : memref<1x8x18x288xf32, #tpu.memory_space<vmem>>, vector<1x3x16x288xf32>
    %5 = vector.shape_cast %4 : vector<1x3x16x288xf32> to vector<3x16x288xf32>
    %6 = vector.shape_cast %5 : vector<3x16x288xf32> to vector<48x288xf32>
    %c3_i32_2 = arith.constant 3 : i32
    %7 = arith.muli %c0_i32, %c3_i32_2 : i32
    %c0_i32_3 = arith.constant 0 : i32
    %8 = arith.addi %7, %c0_i32_3 : i32
    %9 = arith.index_cast %8 : i32 to index
    %c0_4 = arith.constant 0 : index
    %c0_5 = arith.constant 0 : index
    %10 = vector.load %arg3[%9, %c0_4, %c0_5] : memref<9x288x128xf32, #tpu.memory_space<vmem>>, vector<1x288x128xf32>
    %11 = vector.shape_cast %10 : vector<1x288x128xf32> to vector<288x128xf32>
    %cst_6 = arith.constant dense<0.000000e+00> : vector<48x128xf32>
    %12 = tpu.matmul %6, %11, %cst_6 {dimension_numbers = #tpu.dot_dimension_numbers<[1], [0], [0], [1], [0, 0, 1, 1], [], []>} : vector<48x288xf32>, vector<288x128xf32>, vector<48x128xf32> -> vector<48x128xf32>
    %13 = arith.addf %1, %12 : vector<48x128xf32>
    %14 = arith.addi %0, %c0_i32 : i32
    %c0_7 = arith.constant 0 : index
    %15 = arith.index_cast %14 : i32 to index
    %c1 = arith.constant 1 : index
    %c0_8 = arith.constant 0 : index
    %16 = vector.load %arg2[%c0_7, %15, %c1, %c0_8] : memref<1x8x18x288xf32, #tpu.memory_space<vmem>>, vector<1x3x16x288xf32>
    %17 = vector.shape_cast %16 : vector<1x3x16x288xf32> to vector<3x16x288xf32>
    %18 = vector.shape_cast %17 : vector<3x16x288xf32> to vector<48x288xf32>
    %c3_i32_9 = arith.constant 3 : i32
    %19 = arith.muli %c0_i32, %c3_i32_9 : i32
    %c1_i32 = arith.constant 1 : i32
    %20 = arith.addi %19, %c1_i32 : i32
    %21 = arith.index_cast %20 : i32 to index
    %c0_10 = arith.constant 0 : index
    %c0_11 = arith.constant 0 : index
    %22 = vector.load %arg3[%21, %c0_10, %c0_11] : memref<9x288x128xf32, #tpu.memory_space<vmem>>, vector<1x288x128xf32>
    %23 = vector.shape_cast %22 : vector<1x288x128xf32> to vector<288x128xf32>
    %cst_12 = arith.constant dense<0.000000e+00> : vector<48x128xf32>
    %24 = tpu.matmul %18, %23, %cst_12 {dimension_numbers = #tpu.dot_dimension_numbers<[1], [0], [0], [1], [0, 0, 1, 1], [], []>} : vector<48x288xf32>, vector<288x128xf32>, vector<48x128xf32> -> vector<48x128xf32>
    %25 = arith.addf %13, %24 : vector<48x128xf32>
    %26 = arith.addi %0, %c0_i32 : i32
    %c0_13 = arith.constant 0 : index
    %27 = arith.index_cast %26 : i32 to index
    %c2 = arith.constant 2 : index
    %c0_14 = arith.constant 0 : index
    %28 = vector.load %arg2[%c0_13, %27, %c2, %c0_14] : memref<1x8x18x288xf32, #tpu.memory_space<vmem>>, vector<1x3x16x288xf32>
    %29 = vector.shape_cast %28 : vector<1x3x16x288xf32> to vector<3x16x288xf32>
    %30 = vector.shape_cast %29 : vector<3x16x288xf32> to vector<48x288xf32>
    %c3_i32_15 = arith.constant 3 : i32
    %31 = arith.muli %c0_i32, %c3_i32_15 : i32
    %c2_i32 = arith.constant 2 : i32
    %32 = arith.addi %31, %c2_i32 : i32
    %33 = arith.index_cast %32 : i32 to index
    %c0_16 = arith.constant 0 : index
    %c0_17 = arith.constant 0 : index
    %34 = vector.load %arg3[%33, %c0_16, %c0_17] : memref<9x288x128xf32, #tpu.memory_space<vmem>>, vector<1x288x128xf32>
    %35 = vector.shape_cast %34 : vector<1x288x128xf32> to vector<288x128xf32>
    %cst_18 = arith.constant dense<0.000000e+00> : vector<48x128xf32>
    %36 = tpu.matmul %30, %35, %cst_18 {dimension_numbers = #tpu.dot_dimension_numbers<[1], [0], [0], [1], [0, 0, 1, 1], [], []>} : vector<48x288xf32>, vector<288x128xf32>, vector<48x128xf32> -> vector<48x128xf32>
    %37 = arith.addf %25, %36 : vector<48x128xf32>
    %c1_i32_19 = arith.constant 1 : i32
    %38 = arith.addi %0, %c1_i32_19 : i32
    %c0_20 = arith.constant 0 : index
    %39 = arith.index_cast %38 : i32 to index
    %c0_21 = arith.constant 0 : index
    %c0_22 = arith.constant 0 : index
    %40 = vector.load %arg2[%c0_20, %39, %c0_21, %c0_22] : memref<1x8x18x288xf32, #tpu.memory_space<vmem>>, vector<1x3x16x288xf32>
    %41 = vector.shape_cast %40 : vector<1x3x16x288xf32> to vector<3x16x288xf32>
    %42 = vector.shape_cast %41 : vector<3x16x288xf32> to vector<48x288xf32>
    %c3_i32_23 = arith.constant 3 : i32
    %43 = arith.muli %c1_i32_19, %c3_i32_23 : i32
    %c0_i32_24 = arith.constant 0 : i32
    %44 = arith.addi %43, %c0_i32_24 : i32
    %45 = arith.index_cast %44 : i32 to index
    %c0_25 = arith.constant 0 : index
    %c0_26 = arith.constant 0 : index
    %46 = vector.load %arg3[%45, %c0_25, %c0_26] : memref<9x288x128xf32, #tpu.memory_space<vmem>>, vector<1x288x128xf32>
    %47 = vector.shape_cast %46 : vector<1x288x128xf32> to vector<288x128xf32>
    %cst_27 = arith.constant dense<0.000000e+00> : vector<48x128xf32>
    %48 = tpu.matmul %42, %47, %cst_27 {dimension_numbers = #tpu.dot_dimension_numbers<[1], [0], [0], [1], [0, 0, 1, 1], [], []>} : vector<48x288xf32>, vector<288x128xf32>, vector<48x128xf32> -> vector<48x128xf32>
    %49 = arith.addf %37, %48 : vector<48x128xf32>
    %50 = arith.addi %0, %c1_i32_19 : i32
    %c0_28 = arith.constant 0 : index
    %51 = arith.index_cast %50 : i32 to index
    %c1_29 = arith.constant 1 : index
    %c0_30 = arith.constant 0 : index
    %52 = vector.load %arg2[%c0_28, %51, %c1_29, %c0_30] : memref<1x8x18x288xf32, #tpu.memory_space<vmem>>, vector<1x3x16x288xf32>
    %53 = vector.shape_cast %52 : vector<1x3x16x288xf32> to vector<3x16x288xf32>
    %54 = vector.shape_cast %53 : vector<3x16x288xf32> to vector<48x288xf32>
    %c3_i32_31 = arith.constant 3 : i32
    %55 = arith.muli %c1_i32_19, %c3_i32_31 : i32
    %c1_i32_32 = arith.constant 1 : i32
    %56 = arith.addi %55, %c1_i32_32 : i32
    %57 = arith.index_cast %56 : i32 to index
    %c0_33 = arith.constant 0 : index
    %c0_34 = arith.constant 0 : index
    %58 = vector.load %arg3[%57, %c0_33, %c0_34] : memref<9x288x128xf32, #tpu.memory_space<vmem>>, vector<1x288x128xf32>
    %59 = vector.shape_cast %58 : vector<1x288x128xf32> to vector<288x128xf32>
    %cst_35 = arith.constant dense<0.000000e+00> : vector<48x128xf32>
    %60 = tpu.matmul %54, %59, %cst_35 {dimension_numbers = #tpu.dot_dimension_numbers<[1], [0], [0], [1], [0, 0, 1, 1], [], []>} : vector<48x288xf32>, vector<288x128xf32>, vector<48x128xf32> -> vector<48x128xf32>
    %61 = arith.addf %49, %60 : vector<48x128xf32>
    %62 = arith.addi %0, %c1_i32_19 : i32
    %c0_36 = arith.constant 0 : index
    %63 = arith.index_cast %62 : i32 to index
    %c2_37 = arith.constant 2 : index
    %c0_38 = arith.constant 0 : index
    %64 = vector.load %arg2[%c0_36, %63, %c2_37, %c0_38] : memref<1x8x18x288xf32, #tpu.memory_space<vmem>>, vector<1x3x16x288xf32>
    %65 = vector.shape_cast %64 : vector<1x3x16x288xf32> to vector<3x16x288xf32>
    %66 = vector.shape_cast %65 : vector<3x16x288xf32> to vector<48x288xf32>
    %c3_i32_39 = arith.constant 3 : i32
    %67 = arith.muli %c1_i32_19, %c3_i32_39 : i32
    %c2_i32_40 = arith.constant 2 : i32
    %68 = arith.addi %67, %c2_i32_40 : i32
    %69 = arith.index_cast %68 : i32 to index
    %c0_41 = arith.constant 0 : index
    %c0_42 = arith.constant 0 : index
    %70 = vector.load %arg3[%69, %c0_41, %c0_42] : memref<9x288x128xf32, #tpu.memory_space<vmem>>, vector<1x288x128xf32>
    %71 = vector.shape_cast %70 : vector<1x288x128xf32> to vector<288x128xf32>
    %cst_43 = arith.constant dense<0.000000e+00> : vector<48x128xf32>
    %72 = tpu.matmul %66, %71, %cst_43 {dimension_numbers = #tpu.dot_dimension_numbers<[1], [0], [0], [1], [0, 0, 1, 1], [], []>} : vector<48x288xf32>, vector<288x128xf32>, vector<48x128xf32> -> vector<48x128xf32>
    %73 = arith.addf %61, %72 : vector<48x128xf32>
    %c2_i32_44 = arith.constant 2 : i32
    %74 = arith.addi %0, %c2_i32_44 : i32
    %c0_45 = arith.constant 0 : index
    %75 = arith.index_cast %74 : i32 to index
    %c0_46 = arith.constant 0 : index
    %c0_47 = arith.constant 0 : index
    %76 = vector.load %arg2[%c0_45, %75, %c0_46, %c0_47] : memref<1x8x18x288xf32, #tpu.memory_space<vmem>>, vector<1x3x16x288xf32>
    %77 = vector.shape_cast %76 : vector<1x3x16x288xf32> to vector<3x16x288xf32>
    %78 = vector.shape_cast %77 : vector<3x16x288xf32> to vector<48x288xf32>
    %c3_i32_48 = arith.constant 3 : i32
    %79 = arith.muli %c2_i32_44, %c3_i32_48 : i32
    %c0_i32_49 = arith.constant 0 : i32
    %80 = arith.addi %79, %c0_i32_49 : i32
    %81 = arith.index_cast %80 : i32 to index
    %c0_50 = arith.constant 0 : index
    %c0_51 = arith.constant 0 : index
    %82 = vector.load %arg3[%81, %c0_50, %c0_51] : memref<9x288x128xf32, #tpu.memory_space<vmem>>, vector<1x288x128xf32>
    %83 = vector.shape_cast %82 : vector<1x288x128xf32> to vector<288x128xf32>
    %cst_52 = arith.constant dense<0.000000e+00> : vector<48x128xf32>
    %84 = tpu.matmul %78, %83, %cst_52 {dimension_numbers = #tpu.dot_dimension_numbers<[1], [0], [0], [1], [0, 0, 1, 1], [], []>} : vector<48x288xf32>, vector<288x128xf32>, vector<48x128xf32> -> vector<48x128xf32>
    %85 = arith.addf %73, %84 : vector<48x128xf32>
    %86 = arith.addi %0, %c2_i32_44 : i32
    %c0_53 = arith.constant 0 : index
    %87 = arith.index_cast %86 : i32 to index
    %c1_54 = arith.constant 1 : index
    %c0_55 = arith.constant 0 : index
    %88 = vector.load %arg2[%c0_53, %87, %c1_54, %c0_55] : memref<1x8x18x288xf32, #tpu.memory_space<vmem>>, vector<1x3x16x288xf32>
    %89 = vector.shape_cast %88 : vector<1x3x16x288xf32> to vector<3x16x288xf32>
    %90 = vector.shape_cast %89 : vector<3x16x288xf32> to vector<48x288xf32>
    %c3_i32_56 = arith.constant 3 : i32
    %91 = arith.muli %c2_i32_44, %c3_i32_56 : i32
    %c1_i32_57 = arith.constant 1 : i32
    %92 = arith.addi %91, %c1_i32_57 : i32
    %93 = arith.index_cast %92 : i32 to index
    %c0_58 = arith.constant 0 : index
    %c0_59 = arith.constant 0 : index
    %94 = vector.load %arg3[%93, %c0_58, %c0_59] : memref<9x288x128xf32, #tpu.memory_space<vmem>>, vector<1x288x128xf32>
    %95 = vector.shape_cast %94 : vector<1x288x128xf32> to vector<288x128xf32>
    %cst_60 = arith.constant dense<0.000000e+00> : vector<48x128xf32>
    %96 = tpu.matmul %90, %95, %cst_60 {dimension_numbers = #tpu.dot_dimension_numbers<[1], [0], [0], [1], [0, 0, 1, 1], [], []>} : vector<48x288xf32>, vector<288x128xf32>, vector<48x128xf32> -> vector<48x128xf32>
    %97 = arith.addf %85, %96 : vector<48x128xf32>
    %98 = arith.addi %0, %c2_i32_44 : i32
    %c0_61 = arith.constant 0 : index
    %99 = arith.index_cast %98 : i32 to index
    %c2_62 = arith.constant 2 : index
    %c0_63 = arith.constant 0 : index
    %100 = vector.load %arg2[%c0_61, %99, %c2_62, %c0_63] : memref<1x8x18x288xf32, #tpu.memory_space<vmem>>, vector<1x3x16x288xf32>
    %101 = vector.shape_cast %100 : vector<1x3x16x288xf32> to vector<3x16x288xf32>
    %102 = vector.shape_cast %101 : vector<3x16x288xf32> to vector<48x288xf32>
    %c3_i32_64 = arith.constant 3 : i32
    %103 = arith.muli %c2_i32_44, %c3_i32_64 : i32
    %c2_i32_65 = arith.constant 2 : i32
    %104 = arith.addi %103, %c2_i32_65 : i32
    %105 = arith.index_cast %104 : i32 to index
    %c0_66 = arith.constant 0 : index
    %c0_67 = arith.constant 0 : index
    %106 = vector.load %arg3[%105, %c0_66, %c0_67] : memref<9x288x128xf32, #tpu.memory_space<vmem>>, vector<1x288x128xf32>
    %107 = vector.shape_cast %106 : vector<1x288x128xf32> to vector<288x128xf32>
    %cst_68 = arith.constant dense<0.000000e+00> : vector<48x128xf32>
    %108 = tpu.matmul %102, %107, %cst_68 {dimension_numbers = #tpu.dot_dimension_numbers<[1], [0], [0], [1], [0, 0, 1, 1], [], []>} : vector<48x288xf32>, vector<288x128xf32>, vector<48x128xf32> -> vector<48x128xf32>
    %109 = arith.addf %97, %108 : vector<48x128xf32>
    %c3_i32_69 = arith.constant 3 : i32
    %c0_70 = arith.constant 0 : index
    %c0_71 = arith.constant 0 : index
    %110 = vector.load %arg4[%c0_70, %c0_71] : memref<1x128xf32, #tpu.memory_space<vmem>>, vector<1x128xf32>
    %111 = vector.broadcast %110 : vector<1x128xf32> to vector<48x128xf32>
    %112 = arith.addf %109, %111 : vector<48x128xf32>
    %c0_72 = arith.constant 0 : index
    %c0_73 = arith.constant 0 : index
    %113 = vector.load %arg5[%c0_72, %c0_73] : memref<1x1xf32, #tpu.memory_space<vmem>>, vector<1x1xf32>
    %114 = vector.extract %113[0, 0] : f32 from vector<1x1xf32>
    %cst_74 = arith.constant 0.000000e+00 : f32
    %115 = vector.broadcast %cst_74 : f32 to vector<48x128xf32>
    %116 = arith.maximumf %112, %115 : vector<48x128xf32>
    %cst_75 = arith.constant 0.000000e+00 : f32
    %117 = vector.broadcast %cst_75 : f32 to vector<48x128xf32>
    %118 = arith.minimumf %112, %117 : vector<48x128xf32>
    %119 = vector.broadcast %114 : f32 to vector<48x128xf32>
    %120 = arith.mulf %119, %118 : vector<48x128xf32>
    %121 = arith.addf %116, %120 : vector<48x128xf32>
    %122 = vector.shape_cast %121 : vector<48x128xf32> to vector<3x16x128xf32>
    %c0_76 = arith.constant 0 : index
    %c0_77 = arith.constant 0 : index
    %c0_78 = arith.constant 0 : index
    %c0_79 = arith.constant 0 : index
    %123 = vector.load %arg6[%c0_76, %c0_77, %c0_78, %c0_79] : memref<1x3x16x128xf32, #tpu.memory_space<vmem>>, vector<1x3x16x128xf32>
    %124 = vector.shape_cast %123 : vector<1x3x16x128xf32> to vector<3x16x128xf32>
    %125 = vector.shape_cast %122 : vector<3x16x128xf32> to vector<1x3x16x128xf32>
    tpu.vector_store %arg6[%c0_76, %c0_77, %c0_78, %c0_79], %125 {strides = array<i32>} : memref<1x3x16x128xf32, #tpu.memory_space<vmem>>, vector<1x3x16x128xf32>,
    return
  }
  func.func @transform_0(%arg0: i32, %arg1: i32) -> (i32, i32, i32, i32) {
    %c0_i32 = arith.constant 0 : i32
    %c0_i32_0 = arith.constant 0 : i32
    %c0_i32_1 = arith.constant 0 : i32
    %c0_i32_2 = arith.constant 0 : i32
    return %arg0, %c0_i32, %c0_i32_0, %c0_i32_1 : i32, i32, i32, i32
  }
  func.func @transform_1(%arg0: i32, %arg1: i32) -> (i32, i32, i32) {
    %c0_i32 = arith.constant 0 : i32
    %c0_i32_0 = arith.constant 0 : i32
    %c0_i32_1 = arith.constant 0 : i32
    %c0_i32_2 = arith.constant 0 : i32
    return %c0_i32, %c0_i32_0, %c0_i32_1 : i32, i32, i32
  }
  func.func @transform_2(%arg0: i32, %arg1: i32) -> (i32, i32) {
    %c0_i32 = arith.constant 0 : i32
    %c0_i32_0 = arith.constant 0 : i32
    %c0_i32_1 = arith.constant 0 : i32
    return %c0_i32, %c0_i32_0 : i32, i32
  }
  func.func @transform_3(%arg0: i32, %arg1: i32) -> (i32, i32) {
    %c0_i32 = arith.constant 0 : i32
    %c0_i32_0 = arith.constant 0 : i32
    %c0_i32_1 = arith.constant 0 : i32
    return %c0_i32, %c0_i32_0 : i32, i32
  }
  func.func @transform_4(%arg0: i32, %arg1: i32) -> (i32, i32, i32, i32) {
    %c0_i32 = arith.constant 0 : i32
    %c0_i32_0 = arith.constant 0 : i32
    %c0_i32_1 = arith.constant 0 : i32
    return %arg0, %arg1, %c0_i32, %c0_i32_0 : i32, i32, i32, i32
  }
}

</mosaic_0001>

<bundles_post_ra>
// kernel: tile.8
= control target key start
LH: loop header
LB: loop body
LE: loop exit
PB: predicated region body
PF: predicated region fallthrough
CT: control target
= control target key end

     0   :  { %s28_s0 = inlined_call_operand.vmem [shape: f32[8], index: 0, kind: input, shape index: {}]   ;;  %s29_s1 = inlined_call_operand.vmem [shape: f32[16,8], index: 1, kind: output, shape index: {}]  }
   0x1   :  { %v4_v0 = vld [vmem:[%s28_s0] ss:$0 sm:$0xff] }
   0x2   :  { %5 = vst [vmem:[%s29_s1] sm:$0xff] %v4_v0  ;;  %8 = vst [vmem:[%s29_s1 + $0x8] sm:$0xff] %v4_v0 }

// kernel: tile.9
= control target key start
LH: loop header
LB: loop body
LE: loop exit
PB: predicated region body
PF: predicated region fallthrough
CT: control target
= control target key end

     0   :  { %s131_s10 = smov 120   ;;  %s132_s11 = smov 104   ;;  %vm3_vm0 = vcmask 64512   ;;  %vm9_vm1 = vcmask 1048512   ;;  %vm15_vm2 = vcmask 982912   ;;  %vm21_vm3 = vcmask 917312   ;;  %s207_s0 = inlined_call_operand.vmem [shape: f32[16,8], index: 0, kind: input, shape index: {}]   ;;  %s208_s1 = inlined_call_operand.vmem [shape: f32[1,128], index: 1, kind: output, shape index: {}]  }
   0x1   :  { %v101_v0 = vld [vmem:[%s207_s0 + $0xf] sm:$0x1]   ;;  %v103_v1 = vld [vmem:[%s207_s0 + $0xd] sm:$0x1]   ;;  %v102_v2 = vld [vmem:[%s207_s0 + $0xe] sm:$0x1]  }
   0x2   :  { %7 = vrot.lane.b32.xlu0 %v101_v0, %s131_s10  ;;  %19 = vrot.lane.b32.xlu1 %v103_v1, %s132_s11  ;;  %v104_v3 = vld [vmem:[%s207_s0 + $0xc] sm:$0x1]   ;;  %s133_s16 = smov 112   ;;  %s134_s17 = smov 96   ;;  %v105_v4 = vld [vmem:[%s207_s0 + $0xb] sm:$0x1]  }
   0x3   :  { %v106_v5 = vld [vmem:[%s207_s0 + $0xa] sm:$0x1]   ;;  %v2_v6 = vld [vmem:[%s207_s0] sm:$0x1]   ;;  %s135_s24 = smov 88   ;;  %s136_s25 = smov 80  }
   0x4   :  { %4 = vst.msk [vmem:[#allocation0] sm:$0x1] %vm3_vm0, %v2_v6   ;;  %v107_v7 = vld [vmem:[%s207_s0 + $0x9] sm:$0x1]   ;;  %v108_v8 = vld [vmem:[%s207_s0 + $0x8] sm:$0x1]  }
   0x5   :  { %s137_s30 = smov 72   ;;  %s138_s2 = smov 64   ;;  %v109_v9 = vld [vmem:[%s207_s0 + $0x7] sm:$0x1]   ;;  %v110_v10 = vld [vmem:[%s207_s0 + $0x6] sm:$0x1]  }
   0x6   :  { %13 = vrot.lane.b32.xlu0 %v102_v2, %s133_s16  ;;  %25 = vrot.lane.b32.xlu1 %v104_v3, %s134_s17  ;;  %s139_s7 = smov 56   ;;  %s140_s8 = smov 48   ;;  %v111_v11 = vld [vmem:[%s207_s0 + $0x5] sm:$0x1]   ;;  %v112_v12 = vld [vmem:[%s207_s0 + $0x4] sm:$0x1]  }
   0x7   :  { %s141_s13 = smov 40   ;;  %s142_s14 = smov 32   ;;  %v113_v13 = vld [vmem:[%s207_s0 + $0x3] sm:$0x1]   ;;  %v114_v14 = vld [vmem:[%s207_s0 + $0x2] sm:$0x1]  }
   0x8   :  { %s143_s19 = smov 24   ;;  %s144_s20 = smov 16   ;;  %v115_v15 = vld [vmem:[%s207_s0 + $0x1] sm:$0x1]   ;;  %vm27_vm4 = vcmask 851712   ;;  %vm33_vm5 = vcmask 786112  }
   0x9   :  { %s145_s0 = smov 8   ;;  %vm39_vm6 = vcmask 720512   ;;  %vm45_vm7 = vcmask 654912   ;;  %vm51_vm8 = vcmask 589312   ;;  %vm57_vm9 = vcmask 523712  }
   0xa   :  { %31 = vrot.lane.b32.xlu0 %v105_v4, %s135_s24  ;;  %37 = vrot.lane.b32.xlu1 %v106_v5, %s136_s25  ;;  %vm63_vm10 = vcmask 458112   ;;  %vm69_vm11 = vcmask 392512   ;;  %vm75_vm12 = vcmask 326912   ;;  %vm81_vm13 = vcmask 261312  }
   0xb   :  { %vm87_vm14 = vcmask 195712   ;;  %vm93_vm15 = vcmask 130112  }
   0xe   :  { %43 = vrot.lane.b32.xlu0 %v107_v7, %s137_s30  ;;  %49 = vrot.lane.b32.xlu1 %v108_v8, %s138_s2 }
  0x12   :  { %55 = vrot.lane.b32.xlu0 %v109_v9, %s139_s7  ;;  %61 = vrot.lane.b32.xlu1 %v110_v10, %s140_s8 }
  0x16   :  { %67 = vrot.lane.b32.xlu0 %v111_v11, %s141_s13  ;;  %73 = vrot.lane.b32.xlu1 %v112_v12, %s142_s14 }
  0x1a   :  { %79 = vrot.lane.b32.xlu0 %v113_v13, %s143_s19  ;;  %85 = vrot.lane.b32.xlu1 %v114_v14, %s144_s20 }
  0x1e   :  { %91 = vrot.lane.b32.xlu0 %v115_v15, %s145_s0 }
  0x74   :  { %v8_v16 = vpop.permute.xlu0 %7   ;;  %v20_v17 = vpop.permute.xlu1 %19  }
  0x75   :  { %10 = vst.msk [vmem:[#allocation0] sm:$0x1] %vm9_vm1, %v8_v16  }
  0x78   :  { %v14_v18 = vpop.permute.xlu0 %13   ;;  %v26_v19 = vpop.permute.xlu1 %25  }
  0x79   :  { %16 = vst.msk [vmem:[#allocation0] sm:$0x1] %vm15_vm2, %v14_v18  }
  0x7a   :  { %22 = vst.msk [vmem:[#allocation0] sm:$0x1] %vm21_vm3, %v20_v17  }
  0x7b   :  { %28 = vst.msk [vmem:[#allocation0] sm:$0x1] %vm27_vm4, %v26_v19  }
  0x7c   :  { %v32_v20 = vpop.permute.xlu0 %31   ;;  %v38_v21 = vpop.permute.xlu1 %37  }
  0x7d   :  { %34 = vst.msk [vmem:[#allocation0] sm:$0x1] %vm33_vm5, %v32_v20  }
  0x7e   :  { %40 = vst.msk [vmem:[#allocation0] sm:$0x1] %vm39_vm6, %v38_v21  }
  0x80   :  { %v44_v22 = vpop.permute.xlu0 %43   ;;  %v50_v23 = vpop.permute.xlu1 %49  }
  0x81   :  { %46 = vst.msk [vmem:[#allocation0] sm:$0x1] %vm45_vm7, %v44_v22  }
  0x82   :  { %52 = vst.msk [vmem:[#allocation0] sm:$0x1] %vm51_vm8, %v50_v23  }
  0x84   :  { %v56_v24 = vpop.permute.xlu0 %55   ;;  %v62_v25 = vpop.permute.xlu1 %61  }
  0x85   :  { %58 = vst.msk [vmem:[#allocation0] sm:$0x1] %vm57_vm9, %v56_v24  }
  0x86   :  { %64 = vst.msk [vmem:[#allocation0] sm:$0x1] %vm63_vm10, %v62_v25  }
  0x88   :  { %v68_v26 = vpop.permute.xlu0 %67   ;;  %v74_v27 = vpop.permute.xlu1 %73  }
  0x89   :  { %70 = vst.msk [vmem:[#allocation0] sm:$0x1] %vm69_vm11, %v68_v26  }
  0x8a   :  { %76 = vst.msk [vmem:[#allocation0] sm:$0x1] %vm75_vm12, %v74_v27  }
  0x8c   :  { %v80_v28 = vpop.permute.xlu0 %79   ;;  %v86_v29 = vpop.permute.xlu1 %85  }
  0x8d   :  { %82 = vst.msk [vmem:[#allocation0] sm:$0x1] %vm81_vm13, %v80_v28  }
  0x8e   :  { %88 = vst.msk [vmem:[#allocation0] sm:$0x1] %vm87_vm14, %v86_v29  }
  0x90   :  { %v92_v30 = vpop.permute.xlu0 %91  }
  0x91   :  { %94 = vst.msk [vmem:[#allocation0] sm:$0x1] %vm93_vm15, %v92_v30  }
  0x98   :  { %v98_v31 = vld [vmem:[#allocation0] sm:$0x1] }
  0x99   :  { %100 = vst [vmem:[%s208_s1] sm:$0x1] %v98_v31 }

// kernel: block2d_forward.1
= control target key start
LH: loop header
LB: loop body
LE: loop exit
PB: predicated region body
PF: predicated region fallthrough
CT: control target
= control target key end

     0   :  { %s5005_s17 = smov 0   ;;  %s5007_s18 = smov 0   ;;  %s6616_s0 = inlined_call_operand.vmem [shape: f32[2,8,18,288], index: 0, kind: input, shape index: {}]   ;;  %s6617_s1 = inlined_call_operand.vmem [shape: f32[9,288,128], index: 1, kind: input, shape index: {}]   ;;  %s6618_s2 = inlined_call_operand.vmem [shape: f32[1,128], index: 2, kind: input, shape index: {}]   ;;  %s6619_s3 = inlined_call_operand.<no memory space> [shape: f32[1,1], index: 3, kind: input, shape index: {}]   ;;  %s6620_s4 = inlined_call_operand.vmem [shape: f32[2,6,16,128], index: 4, kind: output, shape index: {}]  }
   0x1   :  { %v9_v0 = vstv %s6619_s3  ;;  %s5009_s19 = smov 0   ;;  %s5011_s20 = smov 0  }
   0x2   :  { %10 = vst [vmem:[#allocation2] sm:$0x1] %v9_v0  ;;  %s5013_s21 = smov 0  }
   0x3 LB: > { %s25_s3 = sadd.s32 1, %s4967_s19  ;;  %s28_s22 = sadd.s32 1, %s4971_s20  ;;  %s4975_s21 = sphi %s5013_s21, %s16_s21   ;;  %s4971_s20 = sphi %s5011_s20, %s6624_s20   ;;  %s4967_s19 = sphi %s5009_s19, %s6623_s19   ;;  %s4963_s18 = sphi %s5007_s18, %s6622_s18   ;;  %s4959_s17 = sphi %s5005_s17, %s6621_s17  }
   0x4   : > { %p26_p0 = scmp.ge.s32.totalorder %s25_s3, 2  ;;  %p3254_p1 = scmp.ge.s32.totalorder %s4975_s21, 1 }
   0x5   : > { %p178_p2 = scmp.lt.s32.totalorder %s4975_s21, 5 }
   0x6   : > { %s6626_s3 = smov (%p26_p0, %s25_s3), 0  ;;  %s6628_s22 = smov (!%p26_p0, %s28_s22), %s4971_s20 }
   0x7   : > { %p179_p3 = pnand %p3254_p1, %p178_p2  ;;  %p30_p4 = scmp.ge.s32.totalorder %s6628_s22, 2 }
   0x8   : > { %v3276_v1 = vld [vmem:[%s6617_s1 + $0x1a0] sm:$0xff] (!%p179_p3)  ;;  %v3277_v2 = vld [vmem:[%s6617_s1 + $0x1a8] sm:$0xff] (!%p179_p3)  ;;  %p209_p5 = scmp.lt.s32.totalorder (!%p179_p3), %s4963_s18, 1  ;;  %v3278_v10 = vld [vmem:[%s6617_s1 + $0x1b0] sm:$0xff] (!%p179_p3)  ;;  %s3733_s27 = smul.u32 (!%p179_p3), 216, %s4959_s17  ;;  %vm328_vm0 = vcmask (!%p179_p3), 1046528  }
   0x9   : > { %s6630_s22 = smov (%p30_p4, %s6628_s22), 0  ;;  %182 = sbr.rel (%p179_p3) target bundleno = 470 (0x1d6), region = 36 }
   0xa   : > { %v3260_v3 = vld [vmem:[%s6617_s1 + $0x120] sm:$0xff] (!%p179_p3)  ;;  %v4427_v4 = vpack.c.bf16 (!%p179_p3), %v3277_v2, %v3276_v1  ;;  %v3261_v5 = vld [vmem:[%s6617_s1 + $0x128] sm:$0xff] (!%p179_p3)  ;;  %v3279_v11 = vld [vmem:[%s6617_s1 + $0x1b8] sm:$0xff] (!%p179_p3)  ;;  %vm423_vm1 = vcmask (!%p179_p3), 261120   ;;  %vm867_vm2 = vcmask (!%p179_p3), 1045504  }
   0xb   : > { %v3292_v6 = vld [vmem:[%s6617_s1 + $0x220] sm:$0xff] (!%p179_p3)  ;;  %v3293_v7 = vld [vmem:[%s6617_s1 + $0x228] sm:$0xff] (!%p179_p3)  ;;  %v4429_v8 = vpack.c.bf16 (!%p179_p3), %v3261_v5, %v3260_v3  ;;  %v3262_v12 = vld [vmem:[%s6617_s1 + $0x130] sm:$0xff] (!%p179_p3)  ;;  %v4431_v13 = vpack.c.bf16 (!%p179_p3), %v3279_v11, %v3278_v10 }
   0xc   : > { %v4459_v9 = vpack.c.bf16 (!%p179_p3), %v3293_v7, %v3292_v6  ;;  %4428 = vmatprep.subr.bf16.mxu0 (!%p179_p3), %v4427_v4  ;;  %v3263_v14 = vld [vmem:[%s6617_s1 + $0x138] sm:$0xff] (!%p179_p3)  ;;  %v3294_v15 = vld [vmem:[%s6617_s1 + $0x230] sm:$0xff] (!%p179_p3)  ;;  %v3280_v19 = vld [vmem:[%s6617_s1 + $0x1c0] sm:$0xff] (!%p179_p3) }
   0xd   : > { %v3295_v16 = vld [vmem:[%s6617_s1 + $0x238] sm:$0xff] (!%p179_p3)  ;;  %4430 = vmatpush3.bf16.msra.mxu0 (!%p179_p3), %v4429_v8  ;;  %v4433_v17 = vpack.c.bf16 (!%p179_p3), %v3263_v14, %v3262_v12  ;;  %v3281_v20 = vld [vmem:[%s6617_s1 + $0x1c8] sm:$0xff] (!%p179_p3)  ;;  %v3264_v21 = vld [vmem:[%s6617_s1 + $0x140] sm:$0xff] (!%p179_p3) }
   0xe   : > { %4460 = vmatprep.subr.bf16.mxu1 (!%p179_p3), %v4459_v9  ;;  %v4463_v18 = vpack.c.bf16 (!%p179_p3), %v3295_v16, %v3294_v15  ;;  %4432 = vmatprep.subr.bf16.mxu0 (!%p179_p3), %v4431_v13  ;;  %v4435_v22 = vpack.c.bf16 (!%p179_p3), %v3281_v20, %v3280_v19  ;;  %v3265_v23 = vld [vmem:[%s6617_s1 + $0x148] sm:$0xff] (!%p179_p3)  ;;  %v263_v24 = vld [vmem:[%s6617_s1 + $0x80] sm:$0xff] (!%p179_p3)  ;;  %v3282_v28 = vld [vmem:[%s6617_s1 + $0x1d0] sm:$0xff] (!%p179_p3) }
   0xf   : > { %4462 = vmatpush3.bf16.msra.mxu1 (!%p179_p3), %v4459_v9  ;;  %v264_v25 = vld [vmem:[%s6617_s1 + $0x88] sm:$0xff] (!%p179_p3)  ;;  %v247_v27 = vld [vmem:[%s6617_s1] sm:$0xff] (!%p179_p3)  ;;  %v3283_v30 = vld [vmem:[%s6617_s1 + $0x1d8] sm:$0xff] (!%p179_p3)  ;;  %v4437_v32 = vpack.c.bf16 (!%p179_p3), %v3265_v23, %v3264_v21 }
  0x10   : > { %s6632_s18 = smov (!%p209_p5, %s4963_s18), 1  ;;  %4464 = vmatprep.subr.bf16.mxu1 %v4463_v18  ;;  %v4467_v26 = vpack.c.bf16 %v264_v25, %v263_v24  ;;  %v248_v29 = vld [vmem:[%s6617_s1 + $0x8] sm:$0xff]  ;;  %v3266_v31 = vld [vmem:[%s6617_s1 + $0x150] sm:$0xff]  ;;  %v4439_v39 = vpack.c.bf16 %v3283_v30, %v3282_v28  ;;  %v3267_v40 = vld [vmem:[%s6617_s1 + $0x158] sm:$0xff] }
  0x11   : > { %s4893_s8 = smul.u32 576, %s6632_s18  ;;  %4434 = vmatpush3.bf16.msra.mxu0 %v4433_v17  ;;  %v265_v41 = vld [vmem:[%s6617_s1 + $0x90] sm:$0xff]  ;;  %v266_v42 = vld [vmem:[%s6617_s1 + $0x98] sm:$0xff]  ;;  %v4469_v43 = vpack.c.bf16 %v248_v29, %v247_v27  ;;  %v3284_v44 = vld [vmem:[%s6617_s1 + $0x1e0] sm:$0xff]  ;;  %v4441_v51 = vpack.c.bf16 %v3267_v40, %v3266_v31 }
  0x12   : > { %4436 = vmatprep.subr.bf16.mxu0 %v4435_v22  ;;  %v3285_v45 = vld [vmem:[%s6617_s1 + $0x1e8] sm:$0xff]  ;;  %v4471_v48 = vpack.c.bf16 %v266_v42, %v265_v41  ;;  %v249_v49 = vld [vmem:[%s6617_s1 + $0x10] sm:$0xff]  ;;  %v250_v50 = vld [vmem:[%s6617_s1 + $0x18] sm:$0xff] }
  0x13   : > { %s213_s23 = scalar_lea.vmem %s6616_s0, %s4893_s8  ;;  %4466 = vmatpush3.bf16.msra.mxu1 %v4463_v18  ;;  %v267_v52 = vld [vmem:[%s6617_s1 + $0xa0] sm:$0xff]  ;;  %v268_v53 = vld [vmem:[%s6617_s1 + $0xa8] sm:$0xff]  ;;  %v4443_v54 = vpack.c.bf16 %v3285_v45, %v3284_v44  ;;  %v4473_v57 = vpack.c.bf16 %v250_v50, %v249_v49  ;;  %v3286_v58 = vld [vmem:[%s6617_s1 + $0x1f0] sm:$0xff] }
  0x14   : > { %s5104_s29 = scalar_lea.vmem %s213_s23, %s3733_s27  ;;  %4468 = vmatprep.subr.bf16.mxu1 %v4467_v26  ;;  %v3268_v55 = vld [vmem:[%s6617_s1 + $0x160] sm:$0xff]  ;;  %v3269_v56 = vld [vmem:[%s6617_s1 + $0x168] sm:$0xff]  ;;  %v3287_v59 = vld [vmem:[%s6617_s1 + $0x1f8] sm:$0xff]  ;;  %v4475_v60 = vpack.c.bf16 %v268_v53, %v267_v52 }
  0x15   : > { %v5116_v33 = vld [vmem:[%s5104_s29 + $0x28] sm:$0xff]  ;;  %v285_v34 = vld [vmem:[%s5104_s29 + $0x10] sm:$0xfe]  ;;  %v288_v35 = vld [vmem:[%s5104_s29 + $0x40] sm:$0x1]  ;;  %4438 = vmatpush3.bf16.msra.mxu0 %v4437_v32  ;;  %v4445_v63 = vpack.c.bf16 %v3269_v56, %v3268_v55  ;;  %v4447_v2 = vpack.c.bf16 %v3287_v59, %v3286_v58 }
  0x16   : > { %v335_v36 = vrot.slane %v285_v34, 1  ;;  %v336_v37 = vrot.slane %v5116_v33, 1  ;;  %v342_v38 = vrot.slane %v288_v35, 1  ;;  %4440 = vmatprep.subr.bf16.mxu0 %v4439_v39  ;;  %v251_v61 = vld [vmem:[%s6617_s1 + $0x20] sm:$0xff]  ;;  %v252_v62 = vld [vmem:[%s6617_s1 + $0x28] sm:$0xff]  ;;  %v269_v0 = vld [vmem:[%s6617_s1 + $0xb0] sm:$0xff] }
  0x17   : > { %v270_v1 = vld [vmem:[%s6617_s1 + $0xb8] sm:$0xff]  ;;  %v3270_v3 = vld [vmem:[%s6617_s1 + $0x170] sm:$0xff]  ;;  %v4477_v5 = vpack.c.bf16 %v252_v62, %v251_v61  ;;  %v3288_v6 = vld [vmem:[%s6617_s1 + $0x200] sm:$0xff] }
  0x18   : > { %v337_v46 = vsel %vm328_vm0, %v335_v36, %v336_v37  ;;  %v343_v47 = vsel %vm328_vm0, %v336_v37, %v342_v38  ;;  %v3271_v4 = vld [vmem:[%s6617_s1 + $0x178] sm:$0xff]  ;;  %v3289_v7 = vld [vmem:[%s6617_s1 + $0x208] sm:$0xff]  ;;  %v4479_v8 = vpack.c.bf16 %v270_v1, %v269_v0  ;;  %v253_v9 = vld [vmem:[%s6617_s1 + $0x30] sm:$0xff] }
  0x19   : > { %4282 = vmatprep.mubr.msk.f32.mxu1 %vm423_vm1, %v337_v46  ;;  %4442 = vmatpush3.bf16.msra.mxu0 %v4441_v51  ;;  %v254_v10 = vld [vmem:[%s6617_s1 + $0x38] sm:$0xff]  ;;  %v3272_v11 = vld [vmem:[%s6617_s1 + $0x180] sm:$0xff]  ;;  %v4449_v12 = vpack.c.bf16 %v3271_v4, %v3270_v3  ;;  %v3273_v13 = vld [vmem:[%s6617_s1 + $0x188] sm:$0xff]  ;;  %v4451_v16 = vpack.c.bf16 %v3289_v7, %v3288_v6 }
  0x1a   : > { %4283 = vmatmul.mubr.msk.f32.vlgmr.msra.gmra.mrb[0].mxu1 %vm423_vm1, %v343_v47  ;;  %4444 = vmatprep.subr.bf16.mxu0 %v4443_v54  ;;  %v271_v14 = vld [vmem:[%s6617_s1 + $0xc0] sm:$0xff]  ;;  %v272_v15 = vld [vmem:[%s6617_s1 + $0xc8] sm:$0xff]  ;;  %v4481_v21 = vpack.c.bf16 %v254_v10, %v253_v9  ;;  %v3290_v22 = vld [vmem:[%s6617_s1 + $0x210] sm:$0xff]  ;;  %v4453_v32 = vpack.c.bf16 %v3273_v13, %v3272_v11 }
  0x1b   : > { %4470 = vmatpush3.bf16.msra.mxu1 %v4469_v43  ;;  %v255_v17 = vld [vmem:[%s6617_s1 + $0x40] sm:$0xff]  ;;  %v256_v18 = vld [vmem:[%s6617_s1 + $0x48] sm:$0xff]  ;;  %v3291_v23 = vld [vmem:[%s6617_s1 + $0x218] sm:$0xff]  ;;  %v4483_v27 = vpack.c.bf16 %v272_v15, %v271_v14 }
  0x1c   : > { %4472 = vmatprep.subr.bf16.mxu1 %v4471_v48  ;;  %v5213_v19 = vld [vmem:[%s5104_s29 + $0x20] sm:$0xff]  ;;  %v284_v20 = vld [vmem:[%s5104_s29 + $0x8] sm:$0xfe]  ;;  %v5224_v26 = vld [vmem:[%s5104_s29 + $0x70] sm:$0xff]  ;;  %v4455_v39 = vpack.c.bf16 %v3291_v23, %v3290_v22  ;;  %v4485_v44 = vpack.c.bf16 %v256_v18, %v255_v17 }
  0x1d   : > { %4446 = vmatpush3.bf16.msra.mxu0 %v4445_v63  ;;  %v332_v24 = vrot.slane %v284_v20, 1  ;;  %v333_v25 = vrot.slane %v5213_v19, 1  ;;  %v3274_v28 = vld [vmem:[%s6617_s1 + $0x190] sm:$0xff]  ;;  %v3275_v29 = vld [vmem:[%s6617_s1 + $0x198] sm:$0xff]  ;;  %v351_v31 = vrot.slane %v5224_v26, 1  ;;  %v3324_v42 = vld [vmem:[%s6617_s1 + $0x2c0] sm:$0xff] }
  0x1e   : > { %4448 = vmatprep.subr.bf16.mxu0 %v4447_v2  ;;  %v291_v30 = vld [vmem:[%s5104_s29 + $0x58] sm:$0xfe]  ;;  %v273_v34 = vld [vmem:[%s6617_s1 + $0xd0] sm:$0xff]  ;;  %v294_v38 = vld [vmem:[%s5104_s29 + $0x88] sm:$0x1]  ;;  %v4457_v56 = vpack.c.bf16 %v3275_v29, %v3274_v28 }
  0x1f   : > { %4474 = vmatpush3.bf16.msra.mxu1 %v4473_v57  ;;  %v274_v35 = vld [vmem:[%s6617_s1 + $0xd8] sm:$0xff]  ;;  %v334_v36 = vsel %vm328_vm0, %v332_v24, %v333_v25  ;;  %v350_v37 = vrot.slane %v291_v30, 1  ;;  %v283_v41 = vld [vmem:[%s5104_s29] sm:$0xfe]  ;;  %v357_v43 = vrot.slane %v294_v38, 1  ;;  %v3325_v46 = vld [vmem:[%s6617_s1 + $0x2c8] sm:$0xff] }
  0x20   : > { %4476 = vmatprep.subr.bf16.mxu1 %v4475_v60  ;;  %500 = vmatprep.mubr.f32.mxu0 %v334_v36  ;;  %v5245_v40 = vld [vmem:[%s5104_s29 + $0x18] sm:$0xff]  ;;  %v297_v48 = vld [vmem:[%s5104_s29 + $0xa0] sm:$0xfe]  ;;  %v4487_v49 = vpack.c.bf16 %v274_v35, %v273_v34  ;;  %v257_v50 = vld [vmem:[%s6617_s1 + $0x50] sm:$0xff]  ;;  %v329_v57 = vrot.slane %v283_v41, 1  ;;  %v4507_v62 = vpack.c.bf16 %v3325_v46, %v3324_v42 }
  0x21   : > { %4450 = vmatpush3.bf16.msra.mxu0 %v4449_v12  ;;  %v352_v45 = vsel %vm328_vm0, %v350_v37, %v351_v31  ;;  %v5256_v47 = vld [vmem:[%s5104_s29 + $0xb8] sm:$0xff]  ;;  %v358_v52 = vsel %vm328_vm0, %v351_v31, %v357_v43  ;;  %v365_v53 = vrot.slane %v297_v48, 1  ;;  %v300_v55 = vld [vmem:[%s5104_s29 + $0xd0] sm:$0x1]  ;;  %v330_v58 = vrot.slane %v5245_v40, 1  ;;  %v275_v59 = vld [vmem:[%s6617_s1 + $0xe0] sm:$0xff] }
  0x22   : > { %4452 = vmatprep.subr.bf16.mxu0 %v4451_v16  ;;  %v258_v51 = vld [vmem:[%s6617_s1 + $0x58] sm:$0xff]  ;;  %4285 = vmatprep.mubr.msk.f32.mxu1 %vm423_vm1, %v352_v45  ;;  %v366_v54 = vrot.slane %v5256_v47, 1  ;;  %v276_v60 = vld [vmem:[%s6617_s1 + $0xe8] sm:$0xff]  ;;  %v372_v61 = vrot.slane %v300_v55, 1  ;;  %v3308_v63 = vld [vmem:[%s6617_s1 + $0x240] sm:$0xff] }
  0x23   : > { %4478 = vmatpush3.bf16.msra.mxu1 %v4477_v5  ;;  %v3309_v0 = vld [vmem:[%s6617_s1 + $0x248] sm:$0xff]  ;;  %v259_v1 = vld [vmem:[%s6617_s1 + $0x60] sm:$0xff]  ;;  %v4489_v3 = vpack.c.bf16 %v258_v51, %v257_v50  ;;  %v3326_v4 = vld [vmem:[%s6617_s1 + $0x2d0] sm:$0xff]  ;;  %v331_v12 = vsel %vm328_vm0, %v329_v57, %v330_v58 }
  0x24   : > { %4480 = vmatprep.subr.bf16.mxu1 %v4479_v8  ;;  %4286 = vmatmul.mubr.msk.f32.gmra.mrb[2].mxu1 %vm423_vm1, %v358_v52  ;;  %v367_v2 = vsel %vm328_vm0, %v365_v53, %v366_v54  ;;  %v3327_v5 = vld [vmem:[%s6617_s1 + $0x2d8] sm:$0xff]  ;;  %v373_v6 = vsel %vm328_vm0, %v366_v54, %v372_v61  ;;  %v230_v7 = vld [vmem:[%s5104_s29 + $0x8] sm:$0xff]  ;;  %v4491_v8 = vpack.c.bf16 %v276_v60, %v275_v59  ;;  %v277_v10 = vld [vmem:[%s6617_s1 + $0xf0] sm:$0xff] }
  0x25   : > { %4454 = vmatpush3.bf16.msra.mxu0 %v4453_v32  ;;  %4288 = vmatprep.mubr.msk.f32.mxu1 %vm423_vm1, %v367_v2  ;;  %v260_v9 = vld [vmem:[%s6617_s1 + $0x68] sm:$0xff]  ;;  %v278_v11 = vld [vmem:[%s6617_s1 + $0xf8] sm:$0xff]  ;;  %v4509_v13 = vpack.c.bf16 %v3309_v0, %v3308_v63  ;;  %v3310_v14 = vld [vmem:[%s6617_s1 + $0x250] sm:$0xff]  ;;  %v4511_v17 = vpack.c.bf16 %v3327_v5, %v3326_v4 }
  0x26   : > { %4456 = vmatprep.subr.bf16.mxu0 %v4455_v39  ;;  %v3311_v15 = vld [vmem:[%s6617_s1 + $0x258] sm:$0xff]  ;;  %v261_v18 = vld [vmem:[%s6617_s1 + $0x70] sm:$0xff]  ;;  %v4493_v23 = vpack.c.bf16 %v260_v9, %v259_v1  ;;  %v3328_v24 = vld [vmem:[%s6617_s1 + $0x2e0] sm:$0xff]  ;;  %v4495_v30 = vpack.c.bf16 %v278_v11, %v277_v10 }
  0x27   : > { %4482 = vmatpush3.bf16.msra.mxu1 %v4481_v21  ;;  %v287_v16 = vld [vmem:[%s5104_s29 + $0x38] sm:$0x1]  ;;  %v286_v22 = vld [vmem:[%s5104_s29 + $0x30] sm:$0x1]  ;;  %v5328_v29 = vld [vmem:[%s5104_s29 + $0x68] sm:$0xff]  ;;  %v4513_v31 = vpack.c.bf16 %v3311_v15, %v3310_v14 }
  0x28   : > { %4484 = vmatprep.subr.bf16.mxu1 %v4483_v27  ;;  %4289 = vmatmul.mubr.msk.f32.gmra.mrb[4].mxu1 %vm423_vm1, %v373_v6  ;;  %v262_v20 = vld [vmem:[%s6617_s1 + $0x78] sm:$0xff]  ;;  %v340_v21 = vrot.slane %v287_v16, 1  ;;  %v3329_v27 = vld [vmem:[%s6617_s1 + $0x2e8] sm:$0xff]  ;;  %v338_v28 = vrot.slane %v286_v22, 1  ;;  %v290_v34 = vld [vmem:[%s5104_s29 + $0x50] sm:$0xfe] }
  0x29   : > { %4458 = vmatpush3.bf16.msra.mxu0 %v4457_v56  ;;  %705 = vmatprep.mubr.f32.mxu1 %v230_v7  ;;  %v5335_v35 = vrot.slane %v5328_v29, 1  ;;  %v5338_v36 = vld [vmem:[%s5104_s29 + $0x60] sm:$0xff]  ;;  %v289_v37 = vld [vmem:[%s5104_s29 + $0x48] sm:$0xfe]  ;;  %v347_v41 = vrot.slane %v290_v34, 1  ;;  %v3330_v48 = vld [vmem:[%s6617_s1 + $0x2f0] sm:$0xff] }
  0x2a   : > { %4508 = vmatprep.subr.bf16.mxu0 %v4507_v62  ;;  %v341_v32 = vsel %vm328_vm0, %v333_v25, %v340_v21  ;;  %v279_v38 = vld [vmem:[%s6617_s1 + $0x100] sm:$0xff]  ;;  %v280_v39 = vld [vmem:[%s6617_s1 + $0x108] sm:$0xff]  ;;  %v339_v25 = vsel %vm328_vm0, %v330_v58, %v338_v28  ;;  %v344_v42 = vrot.slane %v289_v37, 1  ;;  %v5349_v43 = vrot.slane %v5338_v36, 1  ;;  %v3331_v50 = vld [vmem:[%s6617_s1 + $0x2f8] sm:$0xff] }
  0x2b   : > { %4486 = vmatpush3.bf16.msra.mxu1 %v4485_v44  ;;  %v4515_v44 = vpack.c.bf16 %v3329_v27, %v3328_v24  ;;  %v3312_v45 = vld [vmem:[%s6617_s1 + $0x260] sm:$0xff]  ;;  %v3313_v46 = vld [vmem:[%s6617_s1 + $0x268] sm:$0xff]  ;;  %v349_v51 = vsel %vm328_vm0, %v347_v41, %v5335_v35  ;;  %v292_v53 = vld [vmem:[%s5104_s29 + $0x78] sm:$0x1]  ;;  %v4499_v54 = vpack.c.bf16 %v280_v39, %v279_v38  ;;  %v4519_v0 = vpack.c.bf16 %v3331_v50, %v3330_v48 }
  0x2c   : > { %4488 = vmatprep.subr.bf16.mxu1 %v4487_v49  ;;  %501 = vmatmul.mubr.f32.vlgmr.msra.gmra.mrb[0].mxu0 %v331_v12  ;;  %v4497_v49 = vpack.c.bf16 %v262_v20, %v261_v18  ;;  %v293_v52 = vld [vmem:[%s5104_s29 + $0x80] sm:$0x1]  ;;  %v3314_v55 = vld [vmem:[%s6617_s1 + $0x270] sm:$0xff]  ;;  %v3315_v56 = vld [vmem:[%s6617_s1 + $0x278] sm:$0xff]  ;;  %v4517_v58 = vpack.c.bf16 %v3313_v46, %v3312_v45  ;;  %v346_v59 = vsel %vm328_vm0, %v344_v42, %v5349_v43  ;;  %v353_v60 = vrot.slane %v292_v53, 1 }
  0x2d   : > { %4510 = vmatpush3.bf16.msra.mxu0 %v4509_v13  ;;  %505 = vmatprep.mubr.f32.mxu0 %v341_v32  ;;  %v355_v57 = vrot.slane %v293_v52, 1  ;;  %v281_v61 = vld [vmem:[%s6617_s1 + $0x110] sm:$0xff]  ;;  %v282_v62 = vld [vmem:[%s6617_s1 + $0x118] sm:$0xff]  ;;  %v5391_v4 = vld [vmem:[%s5104_s29 + $0xa8] sm:$0xff]  ;;  %v4521_v11 = vpack.c.bf16 %v3315_v56, %v3314_v55 }
  0x2e   : > { %4512 = vmatprep.subr.bf16.mxu0 %v4511_v17  ;;  %v5382_v63 = vld [vmem:[%s5104_s29 + $0xb0] sm:$0xff]  ;;  %v296_v2 = vld [vmem:[%s5104_s29 + $0x98] sm:$0xfe]  ;;  %v229_v6 = vld [vmem:[%s5104_s29] sm:$0xff]  ;;  %v4503_v10 = vpack.c.bf16 %v282_v62, %v281_v61  ;;  %v354_v12 = vsel %vm328_vm0, %v5349_v43, %v353_v60  ;;  %v5404_v14 = vrot.slane %v5391_v4, 1 }
  0x2f   : > { %4490 = vmatpush3.bf16.msra.mxu1 %v4489_v3  ;;  %v356_v1 = vsel %vm328_vm0, %v5335_v35, %v355_v57  ;;  %v5388_v3 = vrot.slane %v5382_v63, 1  ;;  %v295_v5 = vld [vmem:[%s5104_s29 + $0x90] sm:$0xfe]  ;;  %v3332_v7 = vld [vmem:[%s6617_s1 + $0x300] sm:$0xff]  ;;  %v362_v9 = vrot.slane %v296_v2, 1  ;;  %v3317_v18 = vld [vmem:[%s6617_s1 + $0x288] sm:$0xff] }
  0x30   : > { %4492 = vmatprep.subr.bf16.mxu1 %v4491_v8  ;;  %506 = vmatmul.mubr.f32.gmra.mrb[2].mxu0 %v339_v25  ;;  %v3333_v8 = vld [vmem:[%s6617_s1 + $0x308] sm:$0xff]  ;;  %v359_v13 = vrot.slane %v295_v5, 1  ;;  %v3316_v17 = vld [vmem:[%s6617_s1 + $0x280] sm:$0xff]  ;;  %v3335_v24 = vld [vmem:[%s6617_s1 + $0x318] sm:$0xff] }
  0x31   : > { %4514 = vmatpush3.bf16.msra.mxu0 %v4513_v31  ;;  %510 = vmatprep.mubr.f32.mxu0 %v349_v51  ;;  %v299_v15 = vld [vmem:[%s5104_s29 + $0xc8] sm:$0x1]  ;;  %v4523_v16 = vpack.c.bf16 %v3333_v8, %v3332_v7  ;;  %v364_v20 = vsel %vm328_vm0, %v362_v9, %v5388_v3  ;;  %v298_v22 = vld [vmem:[%s5104_s29 + $0xc0] sm:$0x1]  ;;  %v832_v27 = vld [vmem:[%s5104_s29 + $0x8] sm:$0xfc] }
  0x32   : > { %4516 = vmatprep.subr.bf16.mxu0 %v4515_v44  ;;  %v370_v21 = vrot.slane %v299_v15, 1  ;;  %v5425_v28 = vld [vmem:[%s5104_s29 + $0x50] sm:$0xff]  ;;  %v361_v31 = vsel %vm328_vm0, %v359_v13, %v5404_v14  ;;  %v368_v32 = vrot.slane %v298_v22, 1  ;;  %v3340_v34 = vld [vmem:[%s6617_s1 + $0x340] sm:$0xff]  ;;  %v3341_v37 = vld [vmem:[%s6617_s1 + $0x348] sm:$0xff]  ;;  %v871_v42 = vrot.slane %v832_v27, 2 }
  0x33   : > { %4494 = vmatpush3.bf16.msra.mxu1 %v4493_v23  ;;  %v3334_v23 = vld [vmem:[%s6617_s1 + $0x310] sm:$0xff]  ;;  %v3319_v25 = vld [vmem:[%s6617_s1 + $0x298] sm:$0xff]  ;;  %v872_v44 = vrot.slane %v5213_v19, 2  ;;  %v5447_v45 = vld [vmem:[%s5104_s29 + $0x48] sm:$0xff]  ;;  %v869_v9 = vrot.slane %v5245_v40, 2 }
  0x34   : > { %4496 = vmatprep.subr.bf16.mxu1 %v4495_v30  ;;  %511 = vmatmul.mubr.f32.gmra.mrb[4].mxu0 %v346_v59  ;;  %v4525_v30 = vpack.c.bf16 %v3317_v18, %v3316_v17  ;;  %v4527_v38 = vpack.c.bf16 %v3335_v24, %v3334_v23  ;;  %v3318_v39 = vld [vmem:[%s6617_s1 + $0x290] sm:$0xff]  ;;  %v371_v41 = vsel %vm328_vm0, %v5388_v3, %v370_v21  ;;  %v3336_v46 = vld [vmem:[%s6617_s1 + $0x320] sm:$0xff]  ;;  %v3337_v48 = vld [vmem:[%s6617_s1 + $0x328] sm:$0xff] }
  0x35   : > { %4518 = vmatpush3.bf16.msra.mxu0 %v4517_v58  ;;  %515 = vmatprep.mubr.f32.mxu0 %v356_v1  ;;  %v4529_v50 = vpack.c.bf16 %v3319_v25, %v3318_v39  ;;  %v369_v51 = vsel %vm328_vm0, %v5404_v14, %v368_v32  ;;  %v4531_v52 = vpack.c.bf16 %v3337_v48, %v3336_v46  ;;  %v3320_v53 = vld [vmem:[%s6617_s1 + $0x2a0] sm:$0xff]  ;;  %v3338_v56 = vld [vmem:[%s6617_s1 + $0x330] sm:$0xff]  ;;  %v3339_v57 = vld [vmem:[%s6617_s1 + $0x338] sm:$0xff] }
  0x36   : > { %4520 = vmatprep.subr.bf16.mxu0 %v4519_v0  ;;  %v873_v55 = vsel %vm867_vm2, %v871_v42, %v872_v44  ;;  %v5478_v58 = vld [vmem:[%s5104_s29 + $0x98] sm:$0xff]  ;;  %v5481_v59 = vld [vmem:[%s5104_s29 + $0x90] sm:$0xff]  ;;  %v4535_v61 = vpack.c.bf16 %v3339_v57, %v3338_v56  ;;  %v831_v1 = vld [vmem:[%s5104_s29] sm:$0xfc] }
  0x37   : > { %4498 = vmatpush3.bf16.msra.mxu1 %v4497_v49  ;;  %v5455_v49 = vpack.c.bf16 %v3341_v37, %v3340_v34  ;;  %v3322_v62 = vld [vmem:[%s6617_s1 + $0x2b0] sm:$0xff]  ;;  %v3323_v0 = vld [vmem:[%s6617_s1 + $0x2b8] sm:$0xff]  ;;  %v3385_v2 = vld [vmem:[%s6617_s1 + $0x3e0] sm:$0xff]  ;;  %v868_v8 = vrot.slane %v831_v1, 2  ;;  %v5535_v37 = vrot.slane %v5328_v29, 2 }
  0x38   : > { %4500 = vmatprep.subr.bf16.mxu1 %v4499_v54  ;;  %516 = vmatmul.mubr.f32.gmra.mrb[6].mxu0 %v354_v12  ;;  %v3386_v5 = vld [vmem:[%s6617_s1 + $0x3e8] sm:$0xff]  ;;  %v4537_v7 = vpack.c.bf16 %v3323_v0, %v3322_v62  ;;  %v834_v15 = vld [vmem:[%s5104_s29 + $0x30] sm:$0x3]  ;;  %v838_v17 = vld [vmem:[%s5104_s29 + $0x50] sm:$0xfc] }
  0x39   : > { %4522 = vmatpush3.bf16.msra.mxu0 %v4521_v11  ;;  %520 = vmatprep.mubr.f32.mxu0 %v364_v20  ;;  %v3369_v11 = vld [vmem:[%s6617_s1 + $0x360] sm:$0xff]  ;;  %v3370_v12 = vld [vmem:[%s6617_s1 + $0x368] sm:$0xff]  ;;  %v231_v18 = vld [vmem:[%s5104_s29 + $0x10] sm:$0xff]  ;;  %v870_v20 = vsel %vm867_vm2, %v868_v8, %v869_v9  ;;  %v877_v22 = vrot.slane %v834_v15, 2  ;;  %v886_v34 = vrot.slane %v838_v17, 2 }
  0x3a   : > { %706 = vmatmul.mubr.f32.vlgmr.msra.gmra.mrb[6].mxu1 %v229_v6  ;;  %4524 = vmatprep.subr.bf16.mxu0 %v4523_v16  ;;  %v835_v6 = vld [vmem:[%s5104_s29 + $0x38] sm:$0x3]  ;;  %v4549_v21 = vpack.c.bf16 %v3370_v12, %v3369_v11  ;;  %v3342_v23 = vld [vmem:[%s6617_s1 + $0x350] sm:$0xff]  ;;  %v3390_v39 = vld [vmem:[%s6617_s1 + $0x408] sm:$0xff] }
  0x3b   : > { %4502 = vmatpush3.bf16.msra.mxu1 %v4499_v54  ;;  %710 = vmatprep.mubr.f32.mxu1 %v5213_v19  ;;  %v3321_v54 = vld [vmem:[%s6617_s1 + $0x2a8] sm:$0xff]  ;;  %v879_v13 = vrot.slane %v835_v6, 2  ;;  %v3388_v16 = vld [vmem:[%s6617_s1 + $0x3f8] sm:$0xff]  ;;  %v3389_v19 = vld [vmem:[%s6617_s1 + $0x400] sm:$0xff] }
  0x3c   : > { %4504 = vmatprep.subr.bf16.mxu1 %v4503_v10  ;;  %521 = vmatmul.mubr.f32.gmra.mrb[8].mxu0 %v361_v31  ;;  %v4533_v60 = vpack.c.bf16 %v3321_v54, %v3320_v53  ;;  %v3343_v24 = vld [vmem:[%s6617_s1 + $0x358] sm:$0xff]  ;;  %v3371_v31 = vld [vmem:[%s6617_s1 + $0x370] sm:$0xff]  ;;  %v841_v25 = vld [vmem:[%s5104_s29 + $0x80] sm:$0x3]  ;;  %v888_v54 = vsel %vm867_vm2, %v886_v34, %v5535_v37 }
  0x3d   : > { %4526 = vmatpush3.bf16.msra.mxu0 %v4525_v30  ;;  %525 = vmatprep.mubr.f32.mxu0 %v371_v41  ;;  %v880_v27 = vsel %vm867_vm2, %v872_v44, %v879_v13  ;;  %v3372_v32 = vld [vmem:[%s6617_s1 + $0x378] sm:$0xff]  ;;  %v4543_v42 = vpack.c.bf16 %v3343_v24, %v3342_v23  ;;  %v878_v44 = vsel %vm867_vm2, %v869_v9, %v877_v22  ;;  %v3402_v53 = vld [vmem:[%s6617_s1 + $0x468] sm:$0xff]  ;;  %v3373_v56 = vld [vmem:[%s6617_s1 + $0x380] sm:$0xff] }
  0x3e   : > { %711 = vmatmul.mubr.f32.gmra.mrb[8].mxu1 %v5245_v40  ;;  %4528 = vmatprep.subr.bf16.mxu0 %v4527_v38  ;;  %v3387_v40 = vld [vmem:[%s6617_s1 + $0x3f0] sm:$0xff]  ;;  %v837_v38 = vld [vmem:[%s5104_s29 + $0x48] sm:$0xfc]  ;;  %v5547_v41 = vld [vmem:[%s5104_s29 + $0x58] sm:$0xff]  ;;  %v4553_v46 = vpack.c.bf16 %v3372_v32, %v3371_v31 }
  0x3f   : > { %715 = vmatprep.mubr.f32.mxu1 %v5425_v28  ;;  %4506 = vmatpush3.bf16.msra.mxu1 %v4503_v10  ;;  %v4547_v10 = vpack.c.bf16 %v3386_v5, %v3385_v2  ;;  %v4551_v30 = vpack.c.bf16 %v3388_v16, %v3387_v40  ;;  %v883_v48 = vrot.slane %v837_v38, 2  ;;  %v3374_v57 = vld [vmem:[%s6617_s1 + $0x388] sm:$0xff]  ;;  %v3391_v62 = vld [vmem:[%s6617_s1 + $0x410] sm:$0xff]  ;;  %v3392_v0 = vld [vmem:[%s6617_s1 + $0x418] sm:$0xff]  ;;  %v5602_v16 = vrot.slane %v5382_v63, 2 }
  0x40   : > { %4540 = vmatprep.subr.bf16.mxu1 %v5455_v49  ;;  %526 = vmatmul.mubr.f32.gmra.mrb[10].mxu0 %v369_v51  ;;  %v833_v51 = vld [vmem:[%s5104_s29 + $0x10] sm:$0xfc]  ;;  %v844_v1 = vld [vmem:[%s5104_s29 + $0x98] sm:$0xfc]  ;;  %v5582_v2 = vld [vmem:[%s5104_s29 + $0xa0] sm:$0xff]  ;;  %v4557_v9 = vpack.c.bf16 %v3374_v57, %v3373_v56  ;;  %v4559_v12 = vpack.c.bf16 %v3392_v0, %v3391_v62  ;;  %v5621_v38 = vrot.slane %v5391_v4, 2 }
  0x41   : > { %4530 = vmatpush3.bf16.msra.mxu0 %v4529_v50  ;;  %1038 = vmatprep.mubr.f32.mxu0 %v873_v55  ;;  %v5551_v50 = vrot.slane %v5338_v36, 2  ;;  %v4555_v55 = vpack.c.bf16 %v3390_v39, %v3389_v19  ;;  %v874_v5 = vrot.slane %v833_v51, 2  ;;  %v836_v6 = vld [vmem:[%s5104_s29 + $0x40] sm:$0x3]  ;;  %v839_v11 = vld [vmem:[%s5104_s29 + $0x58] sm:$0xfc] }
  0x42   : > { %716 = vmatmul.mubr.f32.gmra.mrb[10].mxu1 %v5447_v45  ;;  %4532 = vmatprep.subr.bf16.mxu0 %v4531_v52  ;;  %v3401_v52 = vld [vmem:[%s6617_s1 + $0x460] sm:$0xff]  ;;  %v3375_v13 = vld [vmem:[%s6617_s1 + $0x390] sm:$0xff]  ;;  %v3376_v15 = vld [vmem:[%s6617_s1 + $0x398] sm:$0xff]  ;;  %v901_v40 = vrot.slane %v844_v1, 2  ;;  %v889_v24 = vrot.slane %v839_v11, 2 }
  0x43   : > { %720 = vmatprep.mubr.f32.mxu1 %v5328_v29  ;;  %v885_v8 = vsel %vm867_vm2, %v883_v48, %v5551_v50  ;;  %v843_v17 = vld [vmem:[%s5104_s29 + $0x90] sm:$0xfc]  ;;  %v847_v22 = vld [vmem:[%s5104_s29 + $0xc8] sm:$0x3]  ;;  %v4561_v32 = vpack.c.bf16 %v3376_v15, %v3375_v13  ;;  %v845_v19 = vld [vmem:[%s5104_s29 + $0xa0] sm:$0xfc] }
  0x44   : > { %v898_v34 = vrot.slane %v843_v17, 2  ;;  %v3403_v39 = vld [vmem:[%s6617_s1 + $0x470] sm:$0xff]  ;;  %v3378_v48 = vld [vmem:[%s6617_s1 + $0x3a8] sm:$0xff]  ;;  %v909_v51 = vrot.slane %v847_v22, 2  ;;  %v3396_v56 = vld [vmem:[%s6617_s1 + $0x438] sm:$0xff] }
  0x45   : > { %4534 = vmatpush3.bf16.msra.mxu0 %v4533_v60  ;;  %v894_v60 = vrot.slane %v841_v25, 2  ;;  %v3404_v25 = vld [vmem:[%s6617_s1 + $0x478] sm:$0xff]  ;;  %v848_v0 = vld [vmem:[%s5104_s29 + $0xd0] sm:$0x3]  ;;  %v3397_v15 = vld [vmem:[%s6617_s1 + $0x440] sm:$0xff] }
  0x46   : > { %721 = vmatmul.mubr.f32.gmra.mrb[12].mxu1 %v5338_v36  ;;  %4536 = vmatprep.subr.bf16.mxu0 %v4535_v61  ;;  %v840_v61 = vld [vmem:[%s5104_s29 + $0x78] sm:$0x3]  ;;  %v4583_v62 = vpack.c.bf16 %v3404_v25, %v3403_v39  ;;  %v900_v1 = vsel %vm867_vm2, %v898_v34, %v5621_v38  ;;  %v3379_v11 = vld [vmem:[%s6617_s1 + $0x3b0] sm:$0xff]  ;;  %v911_v13 = vrot.slane %v848_v0, 2  ;;  %v3381_v22 = vld [vmem:[%s6617_s1 + $0x3c0] sm:$0xff] }
  0x47   : > { %725 = vmatprep.mubr.f32.mxu1 %v5478_v58  ;;  %v3457_v39 = vld [vmem:[%s6617_s1 + $0x518] sm:$0xff]  ;;  %v3516_v0 = vld [vmem:[%s6617_s1 + $0x630] sm:$0xff] }
  0x49   : > { %4538 = vmatpush3.bf16.msra.mxu0 %v4537_v7  ;;  %v5586_v7 = vpack.c.bf16 %v3402_v53, %v3401_v52  ;;  %v846_v52 = vld [vmem:[%s5104_s29 + $0xc0] sm:$0x3] }
  0x4a   : > { %726 = vmatmul.mubr.f32.gmra.mrb[14].mxu1 %v5481_v59  ;;  %4548 = vmatprep.subr.bf16.mxu0 %v4547_v10  ;;  %v892_v10 = vrot.slane %v840_v61, 2  ;;  %v905_v61 = vrot.slane %v5256_v47, 2 }
  0x4b   : > { %730 = vmatprep.mubr.f32.mxu1 %v5382_v63 }
  0x4c   : > { %1039 = vmatmul.mubr.f32.vlgmr.msra.gmra.mrb[12].mxu0 %v870_v20  ;;  %v3393_v20 = vld [vmem:[%s6617_s1 + $0x420] sm:$0xff]  ;;  %v893_v31 = vsel %vm867_vm2, %v5551_v50, %v892_v10 }
  0x4d   : > { %4550 = vmatpush3.bf16.msra.mxu0 %v4549_v21  ;;  %1043 = vmatprep.mubr.f32.mxu0 %v880_v27  ;;  %v3394_v21 = vld [vmem:[%s6617_s1 + $0x428] sm:$0xff]  ;;  %v890_v27 = vrot.slane %v5224_v26, 2 }
  0x4e   : > { %731 = vmatmul.mubr.f32.gmra.mrb[16].mxu1 %v5391_v4  ;;  %4552 = vmatprep.subr.bf16.mxu0 %v4551_v30  ;;  %v842_v30 = vld [vmem:[%s5104_s29 + $0x88] sm:$0x3] }
  0x4f   : > { %4299 = vmatprep.mubr.msk.f32.mxu1 %vm423_vm1, %v231_v18  ;;  %v881_v18 = vrot.slane %v836_v6, 2  ;;  %v891_v57 = vsel %vm867_vm2, %v889_v24, %v890_v27  ;;  %v3454_v6 = vld [vmem:[%s6617_s1 + $0x500] sm:$0xff]  ;;  %v912_v24 = vsel %vm867_vm2, %v905_v61, %v911_v13 }
  0x50   : > { %1044 = vmatmul.mubr.f32.gmra.mrb[14].mxu0 %v878_v44  ;;  %v4563_v44 = vpack.c.bf16 %v3394_v21, %v3393_v20 }
  0x51   : > { %4554 = vmatpush3.bf16.msra.mxu0 %v4553_v46  ;;  %1048 = vmatprep.mubr.f32.mxu0 %v888_v54  ;;  %v3377_v46 = vld [vmem:[%s6617_s1 + $0x3a0] sm:$0xff]  ;;  %v896_v54 = vrot.slane %v842_v30, 2  ;;  %v3400_v30 = vld [vmem:[%s6617_s1 + $0x458] sm:$0xff] }
  0x52   : > { %4300 = vmatmul.mubr.msk.f32.vlgmr.msra.gmra.mrb[0].mxu1 %vm423_vm1, %v5116_v33  ;;  %4556 = vmatprep.subr.bf16.mxu0 %v4555_v55  ;;  %v3395_v55 = vld [vmem:[%s6617_s1 + $0x430] sm:$0xff] }
  0x53   : > { %4542 = vmatpush3.bf16.msra.mxu1 %v5455_v49  ;;  %4302 = vmatprep.mubr.msk.f32.mxu1 %vm423_vm1, %v5547_v41  ;;  %v875_v49 = vrot.slane %v5116_v33, 2  ;;  %v895_v33 = vsel %vm867_vm2, %v5535_v37, %v894_v60  ;;  %v904_v60 = vrot.slane %v845_v19, 2  ;;  %v4567_v10 = vpack.c.bf16 %v3396_v56, %v3395_v55  ;;  %v3456_v19 = vld [vmem:[%s6617_s1 + $0x510] sm:$0xff]  ;;  %v3459_v55 = vld [vmem:[%s6617_s1 + $0x528] sm:$0xff] }
  0x54   : > { %4544 = vmatprep.subr.bf16.mxu1 %v4543_v42  ;;  %1049 = vmatmul.mubr.f32.gmra.mrb[16].mxu0 %v885_v8  ;;  %v3455_v8 = vld [vmem:[%s6617_s1 + $0x508] sm:$0xff]  ;;  %v3412_v56 = vld [vmem:[%s5104_s29 + $0x50] sm:$0xfe] }
  0x55   : > { %v876_v23 = vsel %vm867_vm2, %v874_v5, %v875_v49  ;;  %4558 = vmatpush3.bf16.msra.mxu0 %v4557_v9  ;;  %1053 = vmatprep.mubr.f32.mxu0 %v895_v33  ;;  %v882_v53 = vsel %vm867_vm2, %v875_v49, %v881_v18  ;;  %v4565_v5 = vpack.c.bf16 %v3378_v48, %v3377_v46  ;;  %v907_v49 = vrot.slane %v846_v52, 2  ;;  %v3380_v33 = vld [vmem:[%s6617_s1 + $0x3b8] sm:$0xff]  ;;  %v3515_v48 = vld [vmem:[%s6617_s1 + $0x628] sm:$0xff]  ;;  %v3440_v52 = vld [vmem:[%s6617_s1 + $0x490] sm:$0xff] }
  0x56   : > { %4303 = vmatmul.mubr.msk.f32.gmra.mrb[2].mxu1 %vm423_vm1, %v5224_v26  ;;  %4560 = vmatprep.subr.bf16.mxu0 %v4559_v12  ;;  %v910_v9 = vsel %vm867_vm2, %v5602_v16, %v909_v51  ;;  %v897_v12 = vsel %vm867_vm2, %v890_v27, %v896_v54  ;;  %v906_v17 = vsel %vm867_vm2, %v904_v60, %v905_v61  ;;  %v3399_v27 = vld [vmem:[%s6617_s1 + $0x450] sm:$0xff]  ;;  %v3458_v54 = vld [vmem:[%s6617_s1 + $0x520] sm:$0xff]  ;;  %v3499_v61 = vld [vmem:[%s6617_s1 + $0x5a8] sm:$0xff] }
  0x57   : > { %4305 = vmatprep.mubr.msk.f32.mxu1 %vm423_vm1, %v5582_v2  ;;  %4546 = vmatpush3.bf16.msra.mxu1 %v4543_v42  ;;  %v903_v42 = vsel %vm867_vm2, %v901_v40, %v5602_v16  ;;  %v3398_v40 = vld [vmem:[%s6617_s1 + $0x448] sm:$0xff]  ;;  %v4587_v18 = vpack.c.bf16 %v3455_v8, %v3454_v6  ;;  %v4569_v20 = vpack.c.bf16 %v3380_v33, %v3379_v11  ;;  %v3498_v60 = vld [vmem:[%s6617_s1 + $0x5a0] sm:$0xff]  ;;  %v1500_v8 = vrot.slane %v3412_v56, 1  ;;  %v3500_v33 = vld [vmem:[%s6617_s1 + $0x5b0] sm:$0xff] }
  0x58   : > { %4580 = vmatprep.subr.bf16.mxu1 %v5586_v7  ;;  %1054 = vmatmul.mubr.f32.gmra.mrb[18].mxu0 %v893_v31  ;;  %v4571_v21 = vpack.c.bf16 %v3398_v40, %v3397_v15  ;;  %v3438_v31 = vld [vmem:[%s6617_s1 + $0x480] sm:$0xff]  ;;  %v4575_v25 = vpack.c.bf16 %v3400_v30, %v3399_v27  ;;  %v4591_v51 = vpack.c.bf16 %v3457_v39, %v3456_v19  ;;  %v5760_v6 = vld [vmem:[%s5104_s29 + $0xe8] sm:$0xff]  ;;  %v3520_v30 = vld [vmem:[%s6617_s1 + $0x650] sm:$0xff] }
  0x59   : > { %4562 = vmatpush3.bf16.msra.mxu0 %v4561_v32  ;;  %1058 = vmatprep.mubr.f32.mxu0 %v903_v42  ;;  %v3439_v32 = vld [vmem:[%s6617_s1 + $0x488] sm:$0xff]  ;;  %v3383_v42 = vld [vmem:[%s6617_s1 + $0x3d0] sm:$0xff]  ;;  %v3518_v15 = vld [vmem:[%s6617_s1 + $0x640] sm:$0xff] }
  0x5a   : > { %4306 = vmatmul.mubr.msk.f32.gmra.mrb[4].mxu1 %vm423_vm1, %v5256_v47  ;;  %4564 = vmatprep.subr.bf16.mxu0 %v4563_v44  ;;  %v3384_v44 = vld [vmem:[%s6617_s1 + $0x3d8] sm:$0xff]  ;;  %v4589_v46 = vpack.c.bf16 %v3439_v32, %v3438_v31  ;;  %v3519_v40 = vld [vmem:[%s6617_s1 + $0x648] sm:$0xff] }
  0x5b   : > { %4316 = vmatprep.mubr.msk.f32.mxu1 %vm423_vm1, %v876_v23  ;;  %v3382_v23 = vld [vmem:[%s6617_s1 + $0x3c8] sm:$0xff]  ;;  %v3521_v31 = vld [vmem:[%s6617_s1 + $0x658] sm:$0xff] }
  0x5c   : > { %1059 = vmatmul.mubr.f32.gmra.mrb[20].mxu0 %v900_v1  ;;  %v4573_v34 = vpack.c.bf16 %v3382_v23, %v3381_v22  ;;  %v4595_v1 = vpack.c.bf16 %v3459_v55, %v3458_v54  ;;  %v3463_v22 = vld [vmem:[%s6617_s1 + $0x548] sm:$0xff]  ;;  %v4635_v23 = vpack.c.bf16 %v3519_v40, %v3518_v15  ;;  %v3466_v54 = vld [vmem:[%s6617_s1 + $0x560] sm:$0xff]  ;;  %v5900_v15 = vld [vmem:[%s5104_s29 + $0xf0] sm:$0xff] }
  0x5d   : > { %4566 = vmatpush3.bf16.msra.mxu0 %v4565_v5  ;;  %1063 = vmatprep.mubr.f32.mxu0 %v910_v9  ;;  %v3442_v5 = vld [vmem:[%s6617_s1 + $0x4a0] sm:$0xff]  ;;  %v4629_v9 = vpack.c.bf16 %v3499_v61, %v3498_v60  ;;  %v3503_v27 = vld [vmem:[%s6617_s1 + $0x5c8] sm:$0xff]  ;;  %v3524_v61 = vld [vmem:[%s6617_s1 + $0x670] sm:$0xff] }
  0x5e   : > { %4317 = vmatmul.mubr.msk.f32.vlgmr.msra.gmra.mrb[0].mxu1 %vm423_vm1, %v882_v53  ;;  %4568 = vmatprep.subr.bf16.mxu0 %v4567_v10  ;;  %v3441_v53 = vld [vmem:[%s6617_s1 + $0x498] sm:$0xff]  ;;  %v3447_v19 = vld [vmem:[%s6617_s1 + $0x4c8] sm:$0xff]  ;;  %v5858_v55 = vld [vmem:[%s5104_s29 + $0xe0] sm:$0xff] }
  0x5f   : > { %4582 = vmatpush3.bf16.msra.mxu1 %v5586_v7  ;;  %4319 = vmatprep.mubr.msk.f32.mxu1 %vm423_vm1, %v891_v57  ;;  %v908_v7 = vsel %vm867_vm2, %v5621_v38, %v907_v49  ;;  %v3443_v49 = vld [vmem:[%s6617_s1 + $0x4a8] sm:$0xff]  ;;  %v3461_v10 = vld [vmem:[%s6617_s1 + $0x538] sm:$0xff]  ;;  %v3526_v40 = vld [vmem:[%s6617_s1 + $0x680] sm:$0xff] }
  0x60   : > { %4584 = vmatprep.subr.bf16.mxu1 %v4583_v62  ;;  %1064 = vmatmul.mubr.f32.gmra.mrb[22].mxu0 %v908_v7  ;;  %v4597_v13 = vpack.c.bf16 %v3443_v49, %v3442_v5  ;;  %v3445_v7 = vld [vmem:[%s6617_s1 + $0x4b8] sm:$0xff]  ;;  %v3451_v5 = vld [vmem:[%s6617_s1 + $0x4e8] sm:$0xff] }
  0x61   : > { %4570 = vmatpush3.bf16.msra.mxu0 %v4569_v20  ;;  %1311 = vmatprep.mubr.f32.mxu0 %v5425_v28  ;;  %v3514_v28 = vld [vmem:[%s6617_s1 + $0x620] sm:$0xff]  ;;  %v1502_v20 = vsel %vm328_vm0, %v1500_v8, %v5335_v35  ;;  %v5882_v49 = vld [vmem:[%s5104_s29 + $0xd8] sm:$0xff] }
  0x62   : > { %4320 = vmatmul.mubr.msk.f32.gmra.mrb[2].mxu1 %vm423_vm1, %v897_v12  ;;  %4572 = vmatprep.subr.bf16.mxu0 %v4571_v21  ;;  %v4627_v57 = vpack.c.bf16 %v3515_v48, %v3514_v28  ;;  %v3501_v12 = vld [vmem:[%s6617_s1 + $0x5b8] sm:$0xff]  ;;  %v3522_v28 = vld [vmem:[%s6617_s1 + $0x660] sm:$0xff]  ;;  %v3523_v48 = vld [vmem:[%s6617_s1 + $0x668] sm:$0xff] }
  0x63   : > { %4322 = vmatprep.mubr.msk.f32.mxu1 %vm423_vm1, %v906_v17  ;;  %4586 = vmatpush3.bf16.msra.mxu1 %v4583_v62  ;;  %v4593_v62 = vpack.c.bf16 %v3441_v53, %v3440_v52  ;;  %v5785_v17 = vld [vmem:[%s5104_s29 + $0x100] sm:$0xff]  ;;  %v4633_v21 = vpack.c.bf16 %v3501_v12, %v3500_v33  ;;  %v3448_v52 = vld [vmem:[%s6617_s1 + $0x4d0] sm:$0xff]  ;;  %v3449_v53 = vld [vmem:[%s6617_s1 + $0x4d8] sm:$0xff]  ;;  %v4643_v56 = vpack.c.bf16 %v3523_v48, %v3522_v28 }
  0x64   : > { %4588 = vmatprep.subr.bf16.mxu1 %v4587_v18  ;;  %v4609_v60 = vpack.c.bf16 %v3449_v53, %v3448_v52  ;;  %v3509_v33 = vld [vmem:[%s6617_s1 + $0x5f8] sm:$0xff]  ;;  %v3480_v53 = vld [vmem:[%s5104_s29 + $0x48] sm:$0xfc] }
  0x65   : > { %4574 = vmatpush3.bf16.msra.mxu0 %v4573_v34  ;;  %v3446_v34 = vld [vmem:[%s6617_s1 + $0x4c0] sm:$0xff]  ;;  %v3473_v28 = vld [vmem:[%s6617_s1 + $0x598] sm:$0xff] }
  0x66   : > { %4323 = vmatmul.mubr.msk.f32.gmra.mrb[4].mxu1 %vm423_vm1, %v912_v24  ;;  %4576 = vmatprep.subr.bf16.mxu0 %v4575_v25  ;;  %v3502_v24 = vld [vmem:[%s6617_s1 + $0x5c0] sm:$0xff]  ;;  %v3464_v25 = vld [vmem:[%s6617_s1 + $0x550] sm:$0xff]  ;;  %v3513_v52 = vld [vmem:[%s6617_s1 + $0x618] sm:$0xff] }
  0x67   : > { %4333 = vmatprep.mubr.msk.f32.mxu1 %vm423_vm1, %v5547_v41  ;;  %v4577_v41 = vpack.c.bf16 %v3384_v44, %v3383_v42  ;;  %v4637_v39 = vpack.c.bf16 %v3503_v27, %v3502_v24  ;;  %v4639_v42 = vpack.c.bf16 %v3521_v31, %v3520_v30  ;;  %v3504_v44 = vld [vmem:[%s6617_s1 + $0x5d0] sm:$0xff]  ;;  %v3418_v24 = vld [vmem:[%s5104_s29 + $0x80] sm:$0x1]  ;;  %v3511_v30 = vld [vmem:[%s6617_s1 + $0x608] sm:$0xff] }
  0x69   : > { %4578 = vmatpush3.bf16.msra.mxu0 %v4577_v41 }
  0x6a   : > { %4334 = vmatmul.mubr.msk.f32.vlgmr.msra.gmra.mrb[0].mxu1 %vm423_vm1, %v5224_v26  ;;  %v3517_v26 = vld [vmem:[%s6617_s1 + $0x638] sm:$0xff]  ;;  %4628 = vmatprep.subr.bf16.mxu0 %v4627_v57  ;;  %v3506_v57 = vld [vmem:[%s6617_s1 + $0x5e0] sm:$0xff] }
  0x6b   : > { %4590 = vmatpush3.bf16.msra.mxu1 %v4589_v46  ;;  %4336 = vmatprep.mubr.msk.f32.mxu1 %vm423_vm1, %v5582_v2  ;;  %v3460_v2 = vld [vmem:[%s6617_s1 + $0x530] sm:$0xff]  ;;  %v4631_v11 = vpack.c.bf16 %v3517_v26, %v3516_v0  ;;  %v3505_v46 = vld [vmem:[%s6617_s1 + $0x5d8] sm:$0xff] }
  0x6c   : > { %4592 = vmatprep.subr.bf16.mxu1 %v4591_v51  ;;  %1312 = vmatmul.mubr.f32.vlgmr.msra.gmra.mrb[24].mxu0 %v5447_v45  ;;  %v4599_v18 = vpack.c.bf16 %v3461_v10, %v3460_v2  ;;  %v3462_v45 = vld [vmem:[%s6617_s1 + $0x540] sm:$0xff]  ;;  %v4641_v41 = vpack.c.bf16 %v3505_v46, %v3504_v44  ;;  %v3481_v0 = vld [vmem:[%s5104_s29 + $0x50] sm:$0xfc]  ;;  %v5891_v2 = vld [vmem:[%s5104_s29 + $0xf8] sm:$0xff] }
  0x6d   : > { %4630 = vmatpush3.bf16.msra.mxu0 %v4629_v9  ;;  %1316 = vmatprep.mubr.f32.mxu0 %v5328_v29  ;;  %v4603_v32 = vpack.c.bf16 %v3463_v22, %v3462_v45  ;;  %v3469_v9 = vld [vmem:[%s6617_s1 + $0x578] sm:$0xff]  ;;  %v1838_v12 = vrot.slane %v3481_v0, 2  ;;  %v3470_v22 = vld [vmem:[%s6617_s1 + $0x580] sm:$0xff] }
  0x6e   : > { %4337 = vmatmul.mubr.msk.f32.gmra.mrb[2].mxu1 %vm423_vm1, %v5256_v47  ;;  %v3444_v47 = vld [vmem:[%s6617_s1 + $0x4b0] sm:$0xff]  ;;  %4632 = vmatprep.subr.bf16.mxu0 %v4631_v11  ;;  %v3421_v46 = vld [vmem:[%s5104_s29 + $0x98] sm:$0xfe] }
  0x6f   : > { %4594 = vmatpush3.bf16.msra.mxu1 %v4593_v62  ;;  %4339 = vmatprep.mubr.msk.f32.mxu1 %vm423_vm1, %v5760_v6  ;;  %v4601_v29 = vpack.c.bf16 %v3445_v7, %v3444_v47  ;;  %v3525_v62 = vld [vmem:[%s6617_s1 + $0x678] sm:$0xff]  ;;  %v3508_v11 = vld [vmem:[%s6617_s1 + $0x5f0] sm:$0xff]  ;;  %v1840_v31 = vsel %vm867_vm2, %v1838_v12, %v5535_v37 }
  0x70   : > { %4596 = vmatprep.subr.bf16.mxu1 %v4595_v1  ;;  %1317 = vmatmul.mubr.f32.gmra.mrb[26].mxu0 %v5338_v36  ;;  %v3465_v36 = vld [vmem:[%s6617_s1 + $0x558] sm:$0xff]  ;;  %v3450_v1 = vld [vmem:[%s6617_s1 + $0x4e0] sm:$0xff]  ;;  %v4647_v10 = vpack.c.bf16 %v3525_v62, %v3524_v61  ;;  %v3452_v7 = vld [vmem:[%s6617_s1 + $0x4f0] sm:$0xff]  ;;  %v4649_v45 = vpack.c.bf16 %v3509_v33, %v3508_v11 }
  0x71   : > { %4634 = vmatpush3.bf16.msra.mxu0 %v4633_v21  ;;  %1321 = vmatprep.mubr.f32.mxu0 %v5478_v58  ;;  %v4605_v58 = vpack.c.bf16 %v3447_v19, %v3446_v34  ;;  %v4607_v51 = vpack.c.bf16 %v3465_v36, %v3464_v25  ;;  %v3411_v21 = vld [vmem:[%s5104_s29 + $0x48] sm:$0xfe]  ;;  %v3528_v19 = vld [vmem:[%s6617_s1 + $0x690] sm:$0xff]  ;;  %v1508_v36 = vrot.slane %v3418_v24, 1  ;;  %v3483_v11 = vld [vmem:[%s5104_s29 + $0x78] sm:$0x3] }
  0x72   : > { %4340 = vmatmul.mubr.msk.f32.gmra.mrb[4].mxu1 %vm423_vm1, %v5785_v17  ;;  %4636 = vmatprep.subr.bf16.mxu0 %v4635_v23  ;;  %v3471_v23 = vld [vmem:[%s6617_s1 + $0x588] sm:$0xff]  ;;  %v1497_v34 = vrot.slane %v3411_v21, 1  ;;  %v3420_v61 = vld [vmem:[%s5104_s29 + $0x90] sm:$0xfe] }
  0x73   : > { %4598 = vmatpush3.bf16.msra.mxu1 %v4597_v13  ;;  %1667 = vmatprep.mubr.f32.mxu1 %v1502_v20  ;;  %v4613_v13 = vpack.c.bf16 %v3451_v5, %v3450_v1  ;;  %v3453_v20 = vld [vmem:[%s6617_s1 + $0x4f8] sm:$0xff]  ;;  %v4619_v25 = vpack.c.bf16 %v3471_v23, %v3470_v22  ;;  %v3427_v1 = vld [vmem:[%s5104_s29 + $0xc8] sm:$0x1]  ;;  %v3530_v5 = vld [vmem:[%s6617_s1 + $0x6a0] sm:$0xff]  ;;  %v1512_v12 = vrot.slane %v3420_v61, 1  ;;  %v1844_v22 = vrot.slane %v3483_v11, 2 }
  0x74   : > { %4600 = vmatprep.subr.bf16.mxu1 %v4599_v18  ;;  %1322 = vmatmul.mubr.f32.gmra.mrb[28].mxu0 %v5481_v59  ;;  %v3467_v59 = vld [vmem:[%s6617_s1 + $0x568] sm:$0xff]  ;;  %v3430_v23 = vld [vmem:[%s5104_s29 + $0xe0] sm:$0xfe]  ;;  %v3566_v11 = vld [vmem:[%s6617_s1 + $0x6f8] sm:$0xff] }
  0x75   : > { %4638 = vmatpush3.bf16.msra.mxu0 %v4637_v39  ;;  %1326 = vmatprep.mubr.f32.mxu0 %v5382_v63  ;;  %v3507_v63 = vld [vmem:[%s6617_s1 + $0x5e8] sm:$0xff]  ;;  %v4611_v26 = vpack.c.bf16 %v3467_v59, %v3466_v54  ;;  %v3529_v39 = vld [vmem:[%s6617_s1 + $0x698] sm:$0xff]  ;;  %v3575_v59 = vld [vmem:[%s6617_s1 + $0x740] sm:$0xff] }
  0x76   : > { %4640 = vmatprep.subr.bf16.mxu0 %v4639_v42  ;;  %v4645_v8 = vpack.c.bf16 %v3507_v63, %v3506_v57  ;;  %v3527_v18 = vld [vmem:[%s6617_s1 + $0x688] sm:$0xff]  ;;  %v3417_v42 = vld [vmem:[%s5104_s29 + $0x78] sm:$0x1]  ;;  %v4655_v48 = vpack.c.bf16 %v3529_v39, %v3528_v19  ;;  %v3484_v57 = vld [vmem:[%s5104_s29 + $0x80] sm:$0x3]  ;;  %v1509_v63 = vsel %vm328_vm0, %v5335_v35, %v1508_v36 }
  0x77   : > { %4602 = vmatpush3.bf16.msra.mxu1 %v4601_v29  ;;  %v4651_v27 = vpack.c.bf16 %v3527_v18, %v3526_v40  ;;  %v3510_v29 = vld [vmem:[%s6617_s1 + $0x600] sm:$0xff]  ;;  %v1506_v54 = vrot.slane %v3417_v42, 1  ;;  %v3578_v40 = vld [vmem:[%s6617_s1 + $0x758] sm:$0xff]  ;;  %v3580_v39 = vld [vmem:[%s6617_s1 + $0x768] sm:$0xff]  ;;  %v1530_v42 = vrot.slane %v3430_v23, 1 }
  0x78   : > { %4604 = vmatprep.subr.bf16.mxu1 %v4603_v32  ;;  %1327 = vmatmul.mubr.f32.gmra.mrb[30].mxu0 %v5391_v4  ;;  %v3468_v4 = vld [vmem:[%s6617_s1 + $0x570] sm:$0xff]  ;;  %v4617_v32 = vpack.c.bf16 %v3453_v20, %v3452_v7  ;;  %v4653_v44 = vpack.c.bf16 %v3511_v30, %v3510_v29  ;;  %v3487_v18 = vld [vmem:[%s5104_s29 + $0x98] sm:$0xfc]  ;;  %v1523_v7 = vrot.slane %v3427_v1, 1  ;;  %v3426_v20 = vld [vmem:[%s5104_s29 + $0xc0] sm:$0x1] }
  0x79   : > { %4642 = vmatpush3.bf16.msra.mxu0 %v4641_v41  ;;  %1331 = vmatprep.mubr.f32.mxu0 %v5858_v55  ;;  %v4615_v47 = vpack.c.bf16 %v3469_v9, %v3468_v4  ;;  %v1499_v41 = vsel %vm328_vm0, %v1497_v34, %v5349_v43  ;;  %v3559_v4 = vld [vmem:[%s6617_s1 + $0x6c0] sm:$0xff]  ;;  %v3560_v9 = vld [vmem:[%s6617_s1 + $0x6c8] sm:$0xff]  ;;  %v1507_v33 = vsel %vm328_vm0, %v5349_v43, %v1506_v54  ;;  %v3561_v29 = vld [vmem:[%s6617_s1 + $0x6d0] sm:$0xff]  ;;  %v1521_v19 = vrot.slane %v3426_v20, 1 }
  0x7a   : > { %4644 = vmatprep.subr.bf16.mxu0 %v4643_v56  ;;  %v3576_v56 = vld [vmem:[%s6617_s1 + $0x748] sm:$0xff]  ;;  %v3562_v30 = vld [vmem:[%s6617_s1 + $0x6d8] sm:$0xff]  ;;  %v1514_v34 = vsel %vm328_vm0, %v1512_v12, %v5404_v14  ;;  %v1524_v36 = vsel %vm328_vm0, %v5388_v3, %v1523_v7  ;;  %v3489_v54 = vld [vmem:[%s5104_s29 + $0xc0] sm:$0x3]  ;;  %v6064_v12 = vrot.slane %v5891_v2, 2 }
  0x7b   : > { %4606 = vmatpush3.bf16.msra.mxu1 %v4605_v58  ;;  %v3472_v58 = vld [vmem:[%s6617_s1 + $0x590] sm:$0xff]  ;;  %v4667_v35 = vpack.c.bf16 %v3576_v56, %v3575_v59  ;;  %v1522_v59 = vsel %vm328_vm0, %v5404_v14, %v1521_v19  ;;  %v3493_v61 = vld [vmem:[%s5104_s29 + $0xe0] sm:$0xfc]  ;;  %v3435_v14 = vld [vmem:[%s5104_s29 + $0x108] sm:$0x1] }
  0x7c   : > { %4608 = vmatprep.subr.bf16.mxu1 %v4607_v51  ;;  %1332 = vmatmul.mubr.f32.gmra.mrb[32].mxu0 %v5882_v49  ;;  %v3512_v51 = vld [vmem:[%s6617_s1 + $0x610] sm:$0xff]  ;;  %v4623_v62 = vpack.c.bf16 %v3473_v28, %v3472_v58  ;;  %v1845_v58 = vsel %vm867_vm2, %v5551_v50, %v1844_v22  ;;  %v4673_v28 = vpack.c.bf16 %v3562_v30, %v3561_v29  ;;  %v3419_v22 = vld [vmem:[%s5104_s29 + $0x88] sm:$0x1]  ;;  %v6083_v29 = vrot.slane %v5900_v15, 2  ;;  %v3422_v30 = vld [vmem:[%s5104_s29 + $0xa0] sm:$0xfe] }
  0x7d   : > { %4646 = vmatpush3.bf16.msra.mxu0 %v4645_v8  ;;  %1336 = vmatprep.mubr.f32.mxu0 %v5891_v2  ;;  %v4657_v0 = vpack.c.bf16 %v3513_v52, %v3512_v51  ;;  %v3531_v8 = vld [vmem:[%s6617_s1 + $0x6a8] sm:$0xff]  ;;  %v3436_v51 = vld [vmem:[%s5104_s29 + $0x110] sm:$0x1]  ;;  %v3567_v19 = vld [vmem:[%s6617_s1 + $0x700] sm:$0xff] }
  0x7e   : > { %4648 = vmatprep.subr.bf16.mxu0 %v4647_v10  ;;  %v1846_v10 = vrot.slane %v3484_v57, 2  ;;  %v5992_v21 = vpack.c.bf16 %v3531_v8, %v3530_v5  ;;  %v6037_v57 = vrot.slane %v5900_v15, 1  ;;  %v1859_v5 = vrot.slane %v3489_v54, 2  ;;  %v3413_v8 = vld [vmem:[%s5104_s29 + $0x58] sm:$0xfe] }
  0x7f   : > { %4610 = vmatpush3.bf16.msra.mxu1 %v4609_v60  ;;  %v1515_v60 = vrot.slane %v3421_v46, 1  ;;  %v3429_v46 = vld [vmem:[%s5104_s29 + $0xd8] sm:$0xfe]  ;;  %v3496_v7 = vld [vmem:[%s5104_s29 + $0x110] sm:$0x3] }
  0x80   : > { %4612 = vmatprep.subr.bf16.mxu1 %v4611_v26  ;;  %1337 = vmatmul.mubr.f32.gmra.mrb[34].mxu0 %v5900_v15  ;;  %v1835_v26 = vrot.slane %v3480_v53, 2  ;;  %v1847_v24 = vsel %vm867_vm2, %v5535_v37, %v1846_v10  ;;  %v3579_v37 = vld [vmem:[%s6617_s1 + $0x760] sm:$0xff]  ;;  %v1527_v56 = vrot.slane %v3429_v46, 1  ;;  %v3565_v10 = vld [vmem:[%s6617_s1 + $0x6f0] sm:$0xff]  ;;  %v1860_v23 = vsel %vm867_vm2, %v5621_v38, %v1859_v5  ;;  %v3586_v46 = vld [vmem:[%s6617_s1 + $0x798] sm:$0xff] }
  0x81   : > { %4650 = vmatpush3.bf16.msra.mxu0 %v4649_v45  ;;  %2005 = vmatprep.mubr.f32.mxu0 %v1840_v31  ;;  %v4669_v45 = vpack.c.bf16 %v3560_v9, %v3559_v4  ;;  %v1853_v31 = vrot.slane %v3487_v18, 2  ;;  %v4675_v52 = vpack.c.bf16 %v3580_v39, %v3579_v37  ;;  %v3563_v53 = vld [vmem:[%s6617_s1 + $0x6e0] sm:$0xff]  ;;  %v1876_v37 = vrot.slane %v3496_v7, 2  ;;  %v3495_v39 = vld [vmem:[%s5104_s29 + $0x108] sm:$0x3]  ;;  %v3533_v54 = vld [vmem:[%s6617_s1 + $0x6b8] sm:$0xff] }
  0x82   : > { %4652 = vmatprep.subr.bf16.mxu0 %v4651_v27  ;;  %v1837_v43 = vsel %vm867_vm2, %v1835_v26, %v5551_v50  ;;  %v3583_v18 = vld [vmem:[%s6617_s1 + $0x780] sm:$0xff]  ;;  %v1534_v5 = vrot.slane %v5785_v17, 1 }
  0x83   : > { %4614 = vmatpush3.bf16.msra.mxu1 %v4613_v13  ;;  %v3577_v13 = vld [vmem:[%s6617_s1 + $0x750] sm:$0xff] }
  0x84   : > { %4616 = vmatprep.subr.bf16.mxu1 %v4615_v47  ;;  %v1517_v47 = vsel %vm328_vm0, %v1515_v60, %v5388_v3  ;;  %v4671_v27 = vpack.c.bf16 %v3578_v40, %v3577_v13  ;;  %v1855_v3 = vsel %vm867_vm2, %v1853_v31, %v5602_v16  ;;  %v3582_v60 = vld [vmem:[%s6617_s1 + $0x778] sm:$0xff]  ;;  %v1529_v40 = vsel %vm328_vm0, %v1527_v56, %v6037_v57 }
  0x85   : > { %4654 = vmatpush3.bf16.msra.mxu0 %v4653_v44  ;;  %v6018_v44 = vrot.slane %v5891_v2, 1  ;;  %v3492_v13 = vld [vmem:[%s5104_s29 + $0xd8] sm:$0xfc] }
  0x86   : > { %4656 = vmatprep.subr.bf16.mxu0 %v4655_v48  ;;  %v6087_v31 = vld [vmem:[%s5104_s29 + $0xb8] sm:$0xff] }
  0x87   : > { %4618 = vmatpush3.bf16.msra.mxu1 %v4617_v32  ;;  %v3486_v32 = vld [vmem:[%s5104_s29 + $0x90] sm:$0xfc] }
  0x88   : > { %4620 = vmatprep.subr.bf16.mxu1 %v4619_v25  ;;  %v1850_v48 = vrot.slane %v3486_v32, 2 }
  0x89   : > { %4658 = vmatpush3.bf16.msra.mxu0 %v4657_v0  ;;  %v1538_v0 = vrot.slane %v3436_v51, 1  ;;  %v3428_v51 = vld [vmem:[%s5104_s29 + $0xd0] sm:$0x1] }
  0x8a   : > { %1668 = vmatmul.mubr.f32.vlgmr.msra.gmra.mrb[18].mxu1 %v1499_v41  ;;  %4668 = vmatprep.subr.bf16.mxu0 %v4667_v35  ;;  %v3564_v41 = vld [vmem:[%s6617_s1 + $0x6e8] sm:$0xff]  ;;  %v1852_v26 = vsel %vm867_vm2, %v1850_v48, %v5621_v38  ;;  %v6053_v35 = vld [vmem:[%s5104_s29 + $0x70] sm:$0xff]  ;;  %v6108_v48 = vrot.slane %v6087_v31, 1 }
  0x8b   : > { %4622 = vmatpush3.bf16.msra.mxu1 %v4619_v25  ;;  %1672 = vmatprep.mubr.f32.mxu1 %v1509_v63  ;;  %v3490_v25 = vld [vmem:[%s5104_s29 + $0xc8] sm:$0x3]  ;;  %v3581_v63 = vld [vmem:[%s6617_s1 + $0x770] sm:$0xff]  ;;  %v4677_v1 = vpack.c.bf16 %v3564_v41, %v3563_v53  ;;  %v1539_v20 = vsel %vm328_vm0, %v6018_v44, %v1538_v0  ;;  %v1874_v53 = vrot.slane %v3495_v39, 2  ;;  %v3587_v0 = vld [vmem:[%s6617_s1 + $0x7a0] sm:$0xff] }
  0x8c   : > { %4624 = vmatprep.subr.bf16.mxu1 %v4623_v62  ;;  %2006 = vmatmul.mubr.f32.vlgmr.msra.gmra.mrb[36].mxu0 %v1837_v43  ;;  %v1861_v50 = vrot.slane %v3490_v25, 2  ;;  %v4679_v9 = vpack.c.bf16 %v3582_v60, %v3581_v63  ;;  %v1503_v43 = vrot.slane %v3413_v8, 1  ;;  %v3568_v38 = vld [vmem:[%s6617_s1 + $0x708] sm:$0xff]  ;;  %v3569_v63 = vld [vmem:[%s6617_s1 + $0x710] sm:$0xff]  ;;  %v3570_v60 = vld [vmem:[%s6617_s1 + $0x718] sm:$0xff] }
  0x8d   : > { %4670 = vmatpush3.bf16.msra.mxu0 %v4669_v45  ;;  %2010 = vmatprep.mubr.f32.mxu0 %v1847_v24  ;;  %v1504_v45 = vrot.slane %v6053_v35, 1  ;;  %v4681_v24 = vpack.c.bf16 %v3566_v11, %v3565_v10  ;;  %v3431_v41 = vld [vmem:[%s5104_s29 + $0xe8] sm:$0xfe]  ;;  %v4689_v10 = vpack.c.bf16 %v3570_v60, %v3569_v63  ;;  %v3482_v11 = vld [vmem:[%s5104_s29 + $0x58] sm:$0xfc]  ;;  %v3644_v39 = vld [vmem:[%s6617_s1 + $0x860] sm:$0xff] }
  0x8e   : > { %1673 = vmatmul.mubr.f32.gmra.mrb[20].mxu1 %v1507_v33  ;;  %4672 = vmatprep.subr.bf16.mxu0 %v4671_v27  ;;  %v1862_v4 = vsel %vm867_vm2, %v5602_v16, %v1861_v50  ;;  %v1868_v33 = vrot.slane %v3493_v61, 2  ;;  %v1536_v16 = vrot.slane %v3435_v14, 1  ;;  %v1865_v27 = vrot.slane %v3492_v13, 2  ;;  %v3532_v50 = vld [vmem:[%s6617_s1 + $0x6b0] sm:$0xff]  ;;  %v3588_v14 = vld [vmem:[%s6617_s1 + $0x7a8] sm:$0xff]  ;;  %v3647_v63 = vld [vmem:[%s6617_s1 + $0x878] sm:$0xff] }
  0x8f   : > { %1677 = vmatprep.mubr.f32.mxu1 %v1517_v47  ;;  %4626 = vmatpush3.bf16.msra.mxu1 %v4623_v62  ;;  %v1532_v62 = vsel %vm328_vm0, %v1530_v42, %v6018_v44  ;;  %v3584_v47 = vld [vmem:[%s6617_s1 + $0x788] sm:$0xff]  ;;  %v3585_v42 = vld [vmem:[%s6617_s1 + $0x790] sm:$0xff]  ;;  %v4663_v8 = vpack.c.bf16 %v3533_v54, %v3532_v50 }
  0x90   : > { %4660 = vmatprep.subr.bf16.mxu1 %v5992_v21  ;;  %2011 = vmatmul.mubr.f32.gmra.mrb[38].mxu0 %v1845_v58  ;;  %v1870_v32 = vsel %vm867_vm2, %v1868_v33, %v6064_v12  ;;  %v1537_v25 = vsel %vm328_vm0, %v6037_v57, %v1536_v16  ;;  %v1505_v58 = vsel %vm328_vm0, %v1503_v43, %v1504_v45  ;;  %v3591_v33 = vld [vmem:[%s6617_s1 + $0x7c0] sm:$0xff]  ;;  %v3592_v13 = vld [vmem:[%s6617_s1 + $0x7c8] sm:$0xff]  ;;  %v3589_v43 = vld [vmem:[%s6617_s1 + $0x7b0] sm:$0xff] }
  0x91   : > { %4674 = vmatpush3.bf16.msra.mxu0 %v4673_v28  ;;  %2015 = vmatprep.mubr.f32.mxu0 %v1855_v3  ;;  %v1518_v28 = vrot.slane %v3422_v30, 1  ;;  %v1867_v3 = vsel %vm867_vm2, %v1865_v27, %v6083_v29  ;;  %v4687_v56 = vpack.c.bf16 %v3586_v46, %v3585_v42  ;;  %v3571_v16 = vld [vmem:[%s6617_s1 + $0x720] sm:$0xff]  ;;  %v4699_v27 = vpack.c.bf16 %v3592_v13, %v3591_v33  ;;  %v3629_v50 = vld [vmem:[%s6617_s1 + $0x7e8] sm:$0xff] }
  0x92   : > { %1678 = vmatmul.mubr.f32.gmra.mrb[22].mxu1 %v1514_v34  ;;  %4676 = vmatprep.subr.bf16.mxu0 %v4675_v52  ;;  %v4683_v34 = vpack.c.bf16 %v3584_v47, %v3583_v18  ;;  %v4685_v52 = vpack.c.bf16 %v3568_v38, %v3567_v19  ;;  %v3572_v18 = vld [vmem:[%s6617_s1 + $0x728] sm:$0xff]  ;;  %v3542_v47 = vld [vmem:[%s5104_s29 + $0x98] sm:$0xff]  ;;  %v3573_v19 = vld [vmem:[%s6617_s1 + $0x730] sm:$0xff]  ;;  %v6188_v46 = vrot.slane %v6087_v31, 2 }
  0x93   : > { %1682 = vmatprep.mubr.f32.mxu1 %v1524_v36  ;;  %v1510_v36 = vrot.slane %v3419_v22, 1  ;;  %v4693_v30 = vpack.c.bf16 %v3572_v18, %v3571_v16  ;;  %v3649_v16 = vld [vmem:[%s6617_s1 + $0x888] sm:$0xff] }
  0x94   : > { %2016 = vmatmul.mubr.f32.gmra.mrb[40].mxu0 %v1852_v26  ;;  %v1520_v26 = vsel %vm328_vm0, %v1518_v28, %v6108_v48 }
  0x95   : > { %4678 = vmatpush3.bf16.msra.mxu0 %v4677_v1  ;;  %2020 = vmatprep.mubr.f32.mxu0 %v1862_v4  ;;  %v1511_v61 = vsel %vm328_vm0, %v1504_v45, %v1510_v36  ;;  %v1533_v1 = vrot.slane %v3431_v41, 1  ;;  %v3437_v4 = vld [vmem:[%s5104_s29 + $0x118] sm:$0x1]  ;;  %v3628_v41 = vld [vmem:[%s6617_s1 + $0x7e0] sm:$0xff] }
  0x96   : > { %1683 = vmatmul.mubr.f32.gmra.mrb[24].mxu1 %v1522_v59  ;;  %4680 = vmatprep.subr.bf16.mxu0 %v4679_v9  ;;  %v1877_v59 = vsel %vm867_vm2, %v6064_v12, %v1876_v37  ;;  %v1875_v9 = vsel %vm867_vm2, %v6083_v29, %v1874_v53  ;;  %v3590_v45 = vld [vmem:[%s6617_s1 + $0x7b8] sm:$0xff] }
  0x97   : > { %1687 = vmatprep.mubr.f32.mxu1 %v1532_v62  ;;  %v1525_v62 = vrot.slane %v3428_v51, 1  ;;  %v1535_v22 = vsel %vm328_vm0, %v1533_v1, %v1534_v5  ;;  %v3494_v51 = vld [vmem:[%s5104_s29 + $0xe8] sm:$0xfc]  ;;  %v4709_v1 = vpack.c.bf16 %v3629_v50, %v3628_v41 }
  0x98   : > { %2021 = vmatmul.mubr.f32.gmra.mrb[42].mxu0 %v1860_v23  ;;  %v1841_v23 = vrot.slane %v3482_v11, 2  ;;  %v3631_v11 = vld [vmem:[%s6617_s1 + $0x7f8] sm:$0xff]  ;;  %v3637_v50 = vld [vmem:[%s6617_s1 + $0x828] sm:$0xff] }
  0x99   : > { %4682 = vmatpush3.bf16.msra.mxu0 %v4681_v24  ;;  %2025 = vmatprep.mubr.f32.mxu0 %v1870_v32  ;;  %v1526_v7 = vsel %vm328_vm0, %v6108_v48, %v1525_v62  ;;  %v3485_v24 = vld [vmem:[%s5104_s29 + $0x88] sm:$0x3]  ;;  %v3488_v32 = vld [vmem:[%s5104_s29 + $0xa0] sm:$0xfc]  ;;  %v1872_v62 = vrot.slane %v5785_v17, 2 }
  0x9a   : > { %1688 = vmatmul.mubr.f32.gmra.mrb[26].mxu1 %v1529_v40  ;;  %4684 = vmatprep.subr.bf16.mxu0 %v4683_v34  ;;  %v4691_v40 = vpack.c.bf16 %v3588_v14, %v3587_v0  ;;  %v4695_v34 = vpack.c.bf16 %v3590_v45, %v3589_v43  ;;  %v1848_v37 = vrot.slane %v3485_v24, 2  ;;  %v1856_v42 = vrot.slane %v3488_v32, 2  ;;  %v3497_v14 = vld [vmem:[%s5104_s29 + $0x118] sm:$0x3]  ;;  %v3632_v45 = vld [vmem:[%s6617_s1 + $0x800] sm:$0xff]  ;;  %v3689_v32 = vld [vmem:[%s6617_s1 + $0x908] sm:$0xff] }
  0x9b   : > { %1692 = vmatprep.mubr.f32.mxu1 %v1539_v20  ;;  %v1540_v20 = vrot.slane %v3437_v4, 1  ;;  %v6226_v4 = vld [vmem:[%s5104_s29 + $0xb0] sm:$0xff]  ;;  %v1878_v13 = vrot.slane %v3497_v14, 2  ;;  %v3651_v24 = vld [vmem:[%s6617_s1 + $0x898] sm:$0xff]  ;;  %v3553_v14 = vld [vmem:[%s5104_s29 + $0x120] sm:$0xff] }
  0x9c   : > { %2026 = vmatmul.mubr.f32.gmra.mrb[44].mxu0 %v1867_v3  ;;  %v3593_v3 = vld [vmem:[%s6617_s1 + $0x7d0] sm:$0xff]  ;;  %v1858_v60 = vsel %vm867_vm2, %v1856_v42, %v6188_v46 }
  0x9d   : > { %4686 = vmatpush3.bf16.msra.mxu0 %v4685_v52  ;;  %2030 = vmatprep.mubr.f32.mxu0 %v1877_v59  ;;  %v1541_v38 = vsel %vm328_vm0, %v1534_v5, %v1540_v20  ;;  %v3594_v52 = vld [vmem:[%s6617_s1 + $0x7d8] sm:$0xff]  ;;  %v3704_v5 = vld [vmem:[%s6617_s1 + $0x980] sm:$0xff] }
  0x9e   : > { %1693 = vmatmul.mubr.f32.gmra.mrb[28].mxu1 %v1537_v25  ;;  %4688 = vmatprep.subr.bf16.mxu0 %v4687_v56  ;;  %v3645_v25 = vld [vmem:[%s6617_s1 + $0x868] sm:$0xff]  ;;  %v3646_v56 = vld [vmem:[%s6617_s1 + $0x870] sm:$0xff]  ;;  %v4703_v0 = vpack.c.bf16 %v3594_v52, %v3593_v3  ;;  %v3708_v3 = vld [vmem:[%s6617_s1 + $0x9a0] sm:$0xff] }
  0x9f   : > { %4350 = vmatprep.mubr.msk.f32.mxu1 %vm423_vm1, %v1505_v58  ;;  %v3491_v58 = vld [vmem:[%s5104_s29 + $0xd0] sm:$0x3]  ;;  %v4707_v53 = vpack.c.bf16 %v3645_v25, %v3644_v39  ;;  %v3652_v25 = vld [vmem:[%s6617_s1 + $0x8a0] sm:$0xff]  ;;  %v3671_v52 = vld [vmem:[%s5104_s29 + $0x98] sm:$0xfc] }
  0xa0   : > { %2031 = vmatmul.mubr.f32.gmra.mrb[46].mxu0 %v1875_v9  ;;  %v1863_v59 = vrot.slane %v3491_v58, 2  ;;  %v4711_v9 = vpack.c.bf16 %v3647_v63, %v3646_v56  ;;  %v3690_v58 = vld [vmem:[%s6617_s1 + $0x910] sm:$0xff]  ;;  %v3602_v56 = vld [vmem:[%s5104_s29 + $0x98] sm:$0xfe] }
  0xa1   : > { %4690 = vmatpush3.bf16.msra.mxu0 %v4689_v10  ;;  %2278 = vmatprep.mubr.f32.mxu0 %v3542_v47  ;;  %v3630_v10 = vld [vmem:[%s6617_s1 + $0x7f0] sm:$0xff] }
  0xa2   : > { %4351 = vmatmul.mubr.msk.f32.vlgmr.msra.gmra.mrb[0].mxu1 %vm423_vm1, %v1511_v61  ;;  %4692 = vmatprep.subr.bf16.mxu0 %v4691_v40  ;;  %v1871_v61 = vrot.slane %v3494_v51, 2  ;;  %v1864_v33 = vsel %vm867_vm2, %v6188_v46, %v1863_v59  ;;  %v3648_v40 = vld [vmem:[%s6617_s1 + $0x880] sm:$0xff]  ;;  %v4713_v20 = vpack.c.bf16 %v3631_v11, %v3630_v10  ;;  %v3655_v59 = vld [vmem:[%s6617_s1 + $0x8b8] sm:$0xff]  ;;  %v3555_v63 = vld [vmem:[%s5104_s29 + $0x130] sm:$0xff]  ;;  %v2467_v11 = vrot.slane %v3602_v56, 1 }
  0xa3   : > { %4662 = vmatpush3.bf16.msra.mxu1 %v5992_v21  ;;  %4353 = vmatprep.mubr.msk.f32.mxu1 %vm423_vm1, %v1520_v26  ;;  %v1842_v21 = vrot.slane %v6053_v35, 2  ;;  %v3574_v35 = vld [vmem:[%s6617_s1 + $0x738] sm:$0xff]  ;;  %v3541_v26 = vld [vmem:[%s5104_s29 + $0x90] sm:$0xff]  ;;  %v4715_v43 = vpack.c.bf16 %v3649_v16, %v3648_v40  ;;  %v3656_v40 = vld [vmem:[%s6617_s1 + $0x8c0] sm:$0xff] }
  0xa4   : > { %4664 = vmatprep.subr.bf16.mxu1 %v4663_v8  ;;  %v4697_v28 = vpack.c.bf16 %v3574_v35, %v3573_v19  ;;  %v1873_v18 = vsel %vm867_vm2, %v1871_v61, %v1872_v62  ;;  %v3706_v19 = vld [vmem:[%s6617_s1 + $0x990] sm:$0xff]  ;;  %v3707_v35 = vld [vmem:[%s6617_s1 + $0x998] sm:$0xff]  ;;  %v3693_v61 = vld [vmem:[%s6617_s1 + $0x928] sm:$0xff] }
  0xa5   : > { %v1843_v36 = vsel %vm867_vm2, %v1841_v23, %v1842_v21  ;;  %4694 = vmatpush3.bf16.msra.mxu0 %v4693_v30  ;;  %v1849_v54 = vsel %vm867_vm2, %v1842_v21, %v1848_v37  ;;  %v1879_v23 = vsel %vm867_vm2, %v1872_v62, %v1878_v13  ;;  %v3650_v21 = vld [vmem:[%s6617_s1 + $0x890] sm:$0xff]  ;;  %v3688_v30 = vld [vmem:[%s6617_s1 + $0x900] sm:$0xff]  ;;  %v4751_v42 = vpack.c.bf16 %v3707_v35, %v3706_v19  ;;  %v3639_v10 = vld [vmem:[%s6617_s1 + $0x838] sm:$0xff] }
  0xa6   : > { %4354 = vmatmul.mubr.msk.f32.gmra.mrb[2].mxu1 %vm423_vm1, %v1526_v7  ;;  %4696 = vmatprep.subr.bf16.mxu0 %v4695_v34  ;;  %v6246_v7 = vld [vmem:[%s5104_s29 + $0xa8] sm:$0xff]  ;;  %v3634_v37 = vld [vmem:[%s6617_s1 + $0x810] sm:$0xff]  ;;  %v4749_v39 = vpack.c.bf16 %v3689_v32, %v3688_v30  ;;  %v2805_v62 = vrot.slane %v3671_v52, 2  ;;  %v3659_v35 = vld [vmem:[%s6617_s1 + $0x8d8] sm:$0xff] }
  0xa7   : > { %4356 = vmatprep.mubr.msk.f32.mxu1 %vm423_vm1, %v1535_v22  ;;  %4666 = vmatpush3.bf16.msra.mxu1 %v4663_v8  ;;  %v3705_v8 = vld [vmem:[%s6617_s1 + $0x988] sm:$0xff]  ;;  %v3658_v19 = vld [vmem:[%s6617_s1 + $0x8d0] sm:$0xff] }
  0xa8   : > { %4700 = vmatprep.subr.bf16.mxu1 %v4699_v27  ;;  %v4747_v47 = vpack.c.bf16 %v3705_v8, %v3704_v5  ;;  %v3633_v22 = vld [vmem:[%s6617_s1 + $0x808] sm:$0xff]  ;;  %v6344_v5 = vld [vmem:[%s5104_s29 + $0x140] sm:$0xff] }
  0xa9   : > { %4698 = vmatpush3.bf16.msra.mxu0 %v4697_v28  ;;  %v4717_v34 = vpack.c.bf16 %v3633_v22, %v3632_v45  ;;  %v3691_v28 = vld [vmem:[%s6617_s1 + $0x918] sm:$0xff]  ;;  %v3657_v16 = vld [vmem:[%s6617_s1 + $0x8c8] sm:$0xff] }
  0xaa   : > { %4357 = vmatmul.mubr.msk.f32.gmra.mrb[4].mxu1 %vm423_vm1, %v1541_v38  ;;  %4708 = vmatprep.subr.bf16.mxu0 %v4707_v53  ;;  %v4719_v38 = vpack.c.bf16 %v3651_v24, %v3650_v21  ;;  %v3554_v53 = vld [vmem:[%s5104_s29 + $0x128] sm:$0xff]  ;;  %v6374_v45 = vld [vmem:[%s5104_s29 + $0x138] sm:$0xff]  ;;  %v4731_v24 = vpack.c.bf16 %v3657_v16, %v3656_v40 }
  0xab   : > { %4367 = vmatprep.mubr.msk.f32.mxu1 %vm423_vm1, %v1843_v36  ;;  %v3653_v36 = vld [vmem:[%s6617_s1 + $0x8a8] sm:$0xff] }
  0xac   : > { %2279 = vmatmul.mubr.f32.vlgmr.msra.gmra.mrb[48].mxu0 %v3541_v26  ;;  %v4723_v41 = vpack.c.bf16 %v3653_v36, %v3652_v25  ;;  %v3713_v21 = vld [vmem:[%s6617_s1 + $0x9c8] sm:$0xff]  ;;  %v3714_v25 = vld [vmem:[%s6617_s1 + $0x9d0] sm:$0xff]  ;;  %v3715_v36 = vld [vmem:[%s6617_s1 + $0x9d8] sm:$0xff] }
  0xad   : > { %4710 = vmatpush3.bf16.msra.mxu0 %v4709_v1  ;;  %2283 = vmatprep.mubr.f32.mxu0 %v6226_v4  ;;  %v3711_v1 = vld [vmem:[%s6617_s1 + $0x9b8] sm:$0xff]  ;;  %v3641_v30 = vld [vmem:[%s6617_s1 + $0x848] sm:$0xff] }
  0xae   : > { %4368 = vmatmul.mubr.msk.f32.vlgmr.msra.gmra.mrb[0].mxu1 %vm423_vm1, %v1849_v54  ;;  %4712 = vmatprep.subr.bf16.mxu0 %v4711_v9  ;;  %v4753_v54 = vpack.c.bf16 %v3691_v28, %v3690_v58  ;;  %v3638_v9 = vld [vmem:[%s6617_s1 + $0x830] sm:$0xff]  ;;  %v3643_v28 = vld [vmem:[%s6617_s1 + $0x858] sm:$0xff]  ;;  %v3661_v52 = vld [vmem:[%s6617_s1 + $0x8e8] sm:$0xff] }
  0xaf   : > { %4702 = vmatpush3.bf16.msra.mxu1 %v4699_v27  ;;  %4370 = vmatprep.mubr.msk.f32.mxu1 %vm423_vm1, %v1858_v60  ;;  %v3543_v27 = vld [vmem:[%s5104_s29 + $0xa0] sm:$0xff]  ;;  %v4729_v22 = vpack.c.bf16 %v3639_v10, %v3638_v9  ;;  %v3642_v58 = vld [vmem:[%s6617_s1 + $0x850] sm:$0xff]  ;;  %v3701_v9 = vld [vmem:[%s6617_s1 + $0x968] sm:$0xff] }
  0xb0   : > { %4704 = vmatprep.subr.bf16.mxu1 %v4703_v0  ;;  %2284 = vmatmul.mubr.f32.gmra.mrb[50].mxu0 %v6246_v7 }
  0xb1   : > { %4714 = vmatpush3.bf16.msra.mxu0 %v4713_v20  ;;  %2288 = vmatprep.mubr.f32.mxu0 %v5858_v55  ;;  %v3635_v55 = vld [vmem:[%s6617_s1 + $0x818] sm:$0xff] }
  0xb2   : > { %4371 = vmatmul.mubr.msk.f32.gmra.mrb[2].mxu1 %vm423_vm1, %v1864_v33  ;;  %4716 = vmatprep.subr.bf16.mxu0 %v4715_v43  ;;  %v4721_v51 = vpack.c.bf16 %v3635_v55, %v3634_v37  ;;  %v2468_v33 = vrot.slane %v6226_v4, 1  ;;  %v3695_v20 = vld [vmem:[%s6617_s1 + $0x938] sm:$0xff]  ;;  %v3696_v37 = vld [vmem:[%s6617_s1 + $0x940] sm:$0xff]  ;;  %v3697_v55 = vld [vmem:[%s6617_s1 + $0x948] sm:$0xff] }
  0xb3   : > { %4373 = vmatprep.mubr.msk.f32.mxu1 %vm423_vm1, %v1873_v18  ;;  %4706 = vmatpush3.bf16.msra.mxu1 %v4703_v0  ;;  %v2806_v0 = vrot.slane %v6226_v4, 2 }
  0xb4   : > { %4748 = vmatprep.subr.bf16.mxu1 %v4747_v47  ;;  %2289 = vmatmul.mubr.f32.gmra.mrb[52].mxu0 %v5882_v49  ;;  %v3709_v49 = vld [vmem:[%s6617_s1 + $0x9a8] sm:$0xff]  ;;  %v3694_v47 = vld [vmem:[%s6617_s1 + $0x930] sm:$0xff]  ;;  %v2469_v32 = vsel %vm328_vm0, %v2467_v11, %v2468_v33 }
  0xb5   : > { %4718 = vmatpush3.bf16.msra.mxu0 %v4717_v34  ;;  %2293 = vmatprep.mubr.f32.mxu0 %v5891_v2  ;;  %v3636_v2 = vld [vmem:[%s6617_s1 + $0x820] sm:$0xff]  ;;  %v4755_v60 = vpack.c.bf16 %v3709_v49, %v3708_v3  ;;  %v2807_v43 = vsel %vm867_vm2, %v2805_v62, %v2806_v0  ;;  %v4761_v34 = vpack.c.bf16 %v3695_v20, %v3694_v47  ;;  %v3718_v11 = vld [vmem:[%s6617_s1 + $0x9f0] sm:$0xff]  ;;  %v3610_v47 = vld [vmem:[%s5104_s29 + $0xd8] sm:$0xfe] }
  0xb6   : > { %4374 = vmatmul.mubr.msk.f32.gmra.mrb[4].mxu1 %vm423_vm1, %v1879_v23  ;;  %4720 = vmatprep.subr.bf16.mxu0 %v4719_v38  ;;  %v4725_v26 = vpack.c.bf16 %v3637_v50, %v3636_v2  ;;  %v3712_v23 = vld [vmem:[%s6617_s1 + $0x9c0] sm:$0xff]  ;;  %v4765_v3 = vpack.c.bf16 %v3697_v55, %v3696_v37  ;;  %v3698_v2 = vld [vmem:[%s6617_s1 + $0x950] sm:$0xff]  ;;  %v3699_v50 = vld [vmem:[%s6617_s1 + $0x958] sm:$0xff] }
  0xb7   : > { %4384 = vmatprep.mubr.msk.f32.mxu1 %vm423_vm1, %v3543_v27  ;;  %v3640_v27 = vld [vmem:[%s6617_s1 + $0x840] sm:$0xff]  ;;  %v4763_v38 = vpack.c.bf16 %v3713_v21, %v3712_v23  ;;  %v4769_v62 = vpack.c.bf16 %v3699_v50, %v3698_v2  ;;  %v3702_v21 = vld [vmem:[%s6617_s1 + $0x970] sm:$0xff]  ;;  %v3616_v37 = vld [vmem:[%s5104_s29 + $0x108] sm:$0x1]  ;;  %v2498_v2 = vrot.slane %v6344_v5, 1 }
  0xb8   : > { %2294 = vmatmul.mubr.f32.gmra.mrb[54].mxu0 %v5900_v15  ;;  %v3710_v15 = vld [vmem:[%s6617_s1 + $0x9b0] sm:$0xff]  ;;  %v3660_v49 = vld [vmem:[%s6617_s1 + $0x8e0] sm:$0xff] }
  0xb9   : > { %4722 = vmatpush3.bf16.msra.mxu0 %v4721_v51  ;;  %2298 = vmatprep.mubr.f32.mxu0 %v3554_v53  ;;  %v4759_v18 = vpack.c.bf16 %v3711_v1, %v3710_v15  ;;  %v3601_v51 = vld [vmem:[%s5104_s29 + $0x90] sm:$0xfe]  ;;  %v3608_v53 = vld [vmem:[%s5104_s29 + $0xc8] sm:$0x1]  ;;  %v3663_v15 = vld [vmem:[%s6617_s1 + $0x8f8] sm:$0xff] }
  0xba   : > { %4385 = vmatmul.mubr.msk.f32.vlgmr.msra.gmra.mrb[0].mxu1 %vm423_vm1, %v6087_v31  ;;  %v3654_v31 = vld [vmem:[%s6617_s1 + $0x8b0] sm:$0xff]  ;;  %4724 = vmatprep.subr.bf16.mxu0 %v4723_v41  ;;  %v4767_v41 = vpack.c.bf16 %v3715_v36, %v3714_v25  ;;  %v2464_v56 = vrot.slane %v3601_v51, 1  ;;  %v2803_v25 = vrot.slane %v6246_v7, 2  ;;  %v3620_v36 = vld [vmem:[%s5104_s29 + $0x128] sm:$0xfe] }
  0xbb   : > { %4750 = vmatpush3.bf16.msra.mxu1 %v4749_v39  ;;  %4387 = vmatprep.mubr.msk.f32.mxu1 %vm423_vm1, %v5760_v6  ;;  %v3692_v6 = vld [vmem:[%s6617_s1 + $0x920] sm:$0xff]  ;;  %v4727_v8 = vpack.c.bf16 %v3655_v59, %v3654_v31  ;;  %v4733_v39 = vpack.c.bf16 %v3641_v30, %v3640_v27  ;;  %v3717_v59 = vld [vmem:[%s6617_s1 + $0x9e8] sm:$0xff]  ;;  %v2479_v30 = vrot.slane %v3610_v47, 1  ;;  %v3609_v47 = vld [vmem:[%s5104_s29 + $0xd0] sm:$0x1] }
  0xbc   : > { %4752 = vmatprep.subr.bf16.mxu1 %v4751_v42  ;;  %v4757_v13 = vpack.c.bf16 %v3693_v61, %v3692_v6  ;;  %2299 = vmatmul.mubr.f32.gmra.mrb[56].mxu0 %v3553_v14  ;;  %v4735_v42 = vpack.c.bf16 %v3659_v35, %v3658_v19  ;;  %v3716_v31 = vld [vmem:[%s6617_s1 + $0x9e0] sm:$0xff]  ;;  %v2475_v6 = vrot.slane %v3608_v53, 1  ;;  %v3674_v19 = vld [vmem:[%s5104_s29 + $0xc8] sm:$0x3] }
  0xbd   : > { %4726 = vmatpush3.bf16.msra.mxu0 %v4725_v26  ;;  %2303 = vmatprep.mubr.f32.mxu0 %v6344_v5  ;;  %v3607_v61 = vld [vmem:[%s5104_s29 + $0xc0] sm:$0x1]  ;;  %v3611_v14 = vld [vmem:[%s5104_s29 + $0xe0] sm:$0xfe]  ;;  %v3662_v26 = vld [vmem:[%s6617_s1 + $0x8f0] sm:$0xff]  ;;  %v4771_v1 = vpack.c.bf16 %v3717_v59, %v3716_v31  ;;  %v2481_v51 = vsel %vm328_vm0, %v2479_v30, %v6037_v57 }
  0xbe   : > { %4388 = vmatmul.mubr.msk.f32.gmra.mrb[2].mxu1 %vm423_vm1, %v5785_v17  ;;  %v6355_v17 = vld [vmem:[%s5104_s29 + $0x148] sm:$0xff]  ;;  %4728 = vmatprep.subr.bf16.mxu0 %v4727_v8  ;;  %v3700_v8 = vld [vmem:[%s6617_s1 + $0x960] sm:$0xff]  ;;  %v2473_v40 = vrot.slane %v3607_v61, 1  ;;  %v2476_v16 = vsel %vm328_vm0, %v2468_v33, %v2475_v6  ;;  %v4743_v20 = vpack.c.bf16 %v3663_v15, %v3662_v26  ;;  %v3670_v33 = vld [vmem:[%s5104_s29 + $0x90] sm:$0xfc] }
  0xbf   : > { %4754 = vmatpush3.bf16.msra.mxu1 %v4753_v54  ;;  %4390 = vmatprep.mubr.msk.f32.mxu1 %vm423_vm1, %v3555_v63  ;;  %v4737_v54 = vpack.c.bf16 %v3643_v28, %v3642_v58  ;;  %v2465_v63 = vrot.slane %v6246_v7, 1  ;;  %v2813_v58 = vrot.slane %v3674_v19, 2  ;;  %v3673_v28 = vld [vmem:[%s5104_s29 + $0xc0] sm:$0x3]  ;;  %v3722_v7 = vld [vmem:[%s6617_s1 + $0xa10] sm:$0xff] }
  0xc0   : > { %4756 = vmatprep.subr.bf16.mxu1 %v4755_v60  ;;  %2304 = vmatmul.mubr.f32.gmra.mrb[58].mxu0 %v6374_v45  ;;  %v4739_v60 = vpack.c.bf16 %v3661_v52, %v3660_v49  ;;  %v3677_v49 = vld [vmem:[%s5104_s29 + $0xe0] sm:$0xfc]  ;;  %v3723_v52 = vld [vmem:[%s6617_s1 + $0xa18] sm:$0xff]  ;;  %v2811_v31 = vrot.slane %v3673_v28, 2 }
  0xc1   : > { %4730 = vmatpush3.bf16.msra.mxu0 %v4729_v22  ;;  %2634 = vmatprep.mubr.f32.mxu0 %v2469_v32  ;;  %v2466_v10 = vsel %vm328_vm0, %v2464_v56, %v2465_v63  ;;  %v3617_v22 = vld [vmem:[%s5104_s29 + $0x110] sm:$0x1]  ;;  %v2474_v27 = vsel %vm328_vm0, %v2465_v63, %v2473_v40  ;;  %v3720_v32 = vld [vmem:[%s6617_s1 + $0xa00] sm:$0xff]  ;;  %v3626_v59 = vld [vmem:[%s5104_s29 + $0x158] sm:$0x1]  ;;  %v2820_v56 = vrot.slane %v3677_v49, 2 }
  0xc2   : > { %4391 = vmatmul.mubr.msk.f32.gmra.mrb[4].mxu1 %vm423_vm1, %v6355_v17  ;;  %4732 = vmatprep.subr.bf16.mxu0 %v4731_v24  ;;  %v3703_v24 = vld [vmem:[%s6617_s1 + $0x978] sm:$0xff]  ;;  %v3619_v50 = vld [vmem:[%s5104_s29 + $0x120] sm:$0xfe]  ;;  %v2505_v4 = vrot.slane %v3626_v59, 1  ;;  %v2812_v15 = vsel %vm867_vm2, %v2803_v25, %v2811_v31  ;;  %v3683_v40 = vld [vmem:[%s5104_s29 + $0x128] sm:$0xfc] }
  0xc3   : > { %4758 = vmatpush3.bf16.msra.mxu1 %v4757_v13  ;;  %2972 = vmatprep.mubr.f32.mxu1 %v2807_v43  ;;  %v3719_v13 = vld [vmem:[%s6617_s1 + $0x9f8] sm:$0xff]  ;;  %v4773_v43 = vpack.c.bf16 %v3701_v9, %v3700_v8  ;;  %v4777_v55 = vpack.c.bf16 %v3703_v24, %v3702_v21  ;;  %v2494_v61 = vrot.slane %v3619_v50, 1  ;;  %v3603_v8 = vld [vmem:[%s5104_s29 + $0xa0] sm:$0xfe]  ;;  %v2835_v24 = vrot.slane %v3683_v40, 2 }
  0xc4   : > { %4760 = vmatprep.subr.bf16.mxu1 %v4759_v18  ;;  %v2482_v18 = vrot.slane %v3611_v14, 1  ;;  %v4775_v23 = vpack.c.bf16 %v3719_v13, %v3718_v11  ;;  %v3676_v63 = vld [vmem:[%s5104_s29 + $0xd8] sm:$0xfc]  ;;  %v3680_v14 = vld [vmem:[%s5104_s29 + $0x110] sm:$0x3] }
  0xc5   : > { %4734 = vmatpush3.bf16.msra.mxu0 %v4733_v39  ;;  %v2802_v39 = vrot.slane %v3670_v33, 2  ;;  %v2828_v9 = vrot.slane %v3680_v14, 2  ;;  %v2836_v33 = vrot.slane %v6344_v5, 2 }
  0xc6   : > { %4736 = vmatprep.subr.bf16.mxu0 %v4735_v42  ;;  %v2484_v35 = vsel %vm328_vm0, %v2482_v18, %v6018_v44  ;;  %v2470_v18 = vrot.slane %v3603_v8, 1 }
  0xc7   : > { %4762 = vmatpush3.bf16.msra.mxu1 %v4761_v34  ;;  %v3721_v34 = vld [vmem:[%s6617_s1 + $0xa08] sm:$0xff]  ;;  %v2829_v21 = vsel %vm867_vm2, %v6064_v12, %v2828_v9 }
  0xc8   : > { %4764 = vmatprep.subr.bf16.mxu1 %v4763_v38  ;;  %v2490_v38 = vrot.slane %v3617_v22, 1  ;;  %v6485_v42 = vpack.c.bf16 %v3721_v34, %v3720_v32  ;;  %v3612_v22 = vld [vmem:[%s5104_s29 + $0xe8] sm:$0xfe]  ;;  %v2477_v32 = vrot.slane %v3609_v47, 1  ;;  %v3686_v34 = vld [vmem:[%s5104_s29 + $0x158] sm:$0x3]  ;;  %v2472_v19 = vsel %vm328_vm0, %v2470_v18, %v6108_v48 }
  0xc9   : > { %4738 = vmatpush3.bf16.msra.mxu0 %v4737_v54  ;;  %v2804_v54 = vsel %vm867_vm2, %v2802_v39, %v2803_v25  ;;  %v3621_v39 = vld [vmem:[%s5104_s29 + $0x130] sm:$0xfe]  ;;  %v2837_v25 = vsel %vm867_vm2, %v2835_v24, %v2836_v33 }
  0xca   : > { %4740 = vmatprep.subr.bf16.mxu0 %v4739_v60  ;;  %v2491_v53 = vsel %vm328_vm0, %v6018_v44, %v2490_v38  ;;  %v2814_v44 = vsel %vm867_vm2, %v2806_v0, %v2813_v58  ;;  %v3625_v0 = vld [vmem:[%s5104_s29 + $0x150] sm:$0x1]  ;;  %v2478_v28 = vsel %vm328_vm0, %v6108_v48, %v2477_v32  ;;  %v2500_v49 = vrot.slane %v3621_v39, 1 }
  0xcb   : > { %4766 = vmatpush3.bf16.msra.mxu1 %v4765_v3  ;;  %v2488_v3 = vrot.slane %v3616_v37, 1  ;;  %v2503_v13 = vrot.slane %v3625_v0, 1  ;;  %v3685_v58 = vld [vmem:[%s5104_s29 + $0x150] sm:$0x3] }
  0xcc   : > { %4768 = vmatprep.subr.bf16.mxu1 %v4767_v41  ;;  %2635 = vmatmul.mubr.f32.vlgmr.msra.gmra.mrb[60].mxu0 %v2466_v10  ;;  %v2497_v41 = vrot.slane %v3620_v36, 1  ;;  %v3679_v10 = vld [vmem:[%s5104_s29 + $0x108] sm:$0x3]  ;;  %v2843_v36 = vrot.slane %v3686_v34, 2 }
  0xcd   : > { %4742 = vmatpush3.bf16.msra.mxu0 %v4739_v60  ;;  %2639 = vmatprep.mubr.f32.mxu0 %v2476_v16  ;;  %v6509_v60 = vpack.c.bf16 %v3723_v52, %v3722_v7  ;;  %v2489_v6 = vsel %vm328_vm0, %v6037_v57, %v2488_v3  ;;  %v2822_v57 = vsel %vm867_vm2, %v2820_v56, %v6064_v12  ;;  %v3618_v12 = vld [vmem:[%s5104_s29 + $0x118] sm:$0x1]  ;;  %v3678_v3 = vld [vmem:[%s5104_s29 + $0xe8] sm:$0xfc]  ;;  %v3627_v7 = vld [vmem:[%s5104_s29 + $0x160] sm:$0x1] }
  0xce   : > { %4744 = vmatprep.subr.bf16.mxu0 %v4743_v20  ;;  %v2499_v26 = vsel %vm328_vm0, %v2497_v41, %v2498_v2  ;;  %v2506_v16 = vsel %vm328_vm0, %v2498_v2, %v2505_v4  ;;  %v3672_v41 = vld [vmem:[%s5104_s29 + $0xa0] sm:$0xfc]  ;;  %v2844_v48 = vsel %vm867_vm2, %v2836_v33, %v2843_v36  ;;  %v2823_v2 = vrot.slane %v3678_v3, 2  ;;  %v3687_v4 = vld [vmem:[%s5104_s29 + $0x160] sm:$0x3] }
  0xcf   : > { %4770 = vmatpush3.bf16.msra.mxu1 %v4769_v62  ;;  %v2495_v62 = vrot.slane %v6374_v45, 1  ;;  %v2507_v59 = vrot.slane %v3627_v7, 1 }
  0xd0   : > { %4772 = vmatprep.subr.bf16.mxu1 %v4771_v1  ;;  %2640 = vmatmul.mubr.f32.gmra.mrb[62].mxu0 %v2474_v27  ;;  %v2817_v1 = vrot.slane %v3676_v63, 2  ;;  %v3682_v27 = vld [vmem:[%s5104_s29 + $0x120] sm:$0xfc]  ;;  %v2808_v63 = vrot.slane %v3672_v41, 2 }
  0xd1   : > { %2644 = vmatprep.mubr.f32.mxu0 %v2484_v35  ;;  %4746 = vmatpush3.bf16.msra.mxu0 %v4743_v20  ;;  %v2496_v11 = vsel %vm328_vm0, %v2494_v61, %v2495_v62  ;;  %v2504_v30 = vsel %vm328_vm0, %v2495_v62, %v2503_v13  ;;  %v2485_v35 = vrot.slane %v3612_v22, 1  ;;  %v2832_v37 = vrot.slane %v3682_v27, 2 }
  0xd2   : > { %4780 = vmatprep.subr.bf16.mxu0 %v6485_v42  ;;  %v2819_v20 = vsel %vm867_vm2, %v2817_v1, %v6083_v29  ;;  %v2810_v1 = vsel %vm867_vm2, %v2808_v63, %v6188_v46 }
  0xd3   : > { %4774 = vmatpush3.bf16.msra.mxu1 %v4773_v43  ;;  %v2826_v43 = vrot.slane %v3679_v10, 2 }
  0xd4   : > { %4776 = vmatprep.subr.bf16.mxu1 %v4775_v23  ;;  %2645 = vmatmul.mubr.f32.gmra.mrb[64].mxu0 %v2481_v51  ;;  %v6533_v23 = vld [vmem:[%s5104_s29 + $0x100] sm:$0xff]  ;;  %v2492_v51 = vrot.slane %v3618_v12, 1 }
  0xd5   : > { %2649 = vmatprep.mubr.f32.mxu0 %v2491_v53  ;;  %v2486_v38 = vrot.slane %v6533_v23, 1  ;;  %v2827_v5 = vsel %vm867_vm2, %v6083_v29, %v2826_v43  ;;  %v2841_v53 = vrot.slane %v3685_v58, 2  ;;  %v2824_v50 = vrot.slane %v6533_v23, 2 }
  0xd7   : > { %4778 = vmatpush3.bf16.msra.mxu1 %v4777_v55  ;;  %v2833_v55 = vrot.slane %v6374_v45, 2  ;;  %v2487_v29 = vsel %vm328_vm0, %v2485_v35, %v2486_v38  ;;  %v2501_v45 = vrot.slane %v6355_v17, 1  ;;  %v2493_v31 = vsel %vm328_vm0, %v2486_v38, %v2492_v51  ;;  %v3117_v51 = vld [vmem:[#allocation2] sm:$0x1] }
  0xd8   : > { %4787 = vmatprep.subr.bf16.mxu1 %v6485_v42  ;;  %2650 = vmatmul.mubr.f32.gmra.mrb[66].mxu0 %v2489_v6  ;;  %v3675_v6 = vld [vmem:[%s5104_s29 + $0xd0] sm:$0x3]  ;;  %4895 = vpush %v3117_v51 }
  0xd9   : > { %2654 = vmatprep.mubr.f32.mxu0 %v2499_v26  ;;  %v2834_v52 = vsel %vm867_vm2, %v2832_v37, %v2833_v55  ;;  %v2502_v56 = vsel %vm328_vm0, %v2500_v49, %v2501_v45  ;;  %v2842_v61 = vsel %vm867_vm2, %v2833_v55, %v2841_v53  ;;  %v2839_v26 = vrot.slane %v6355_v17, 2 }
  0xda   : > { %2973 = vmatmul.mubr.f32.vlgmr.msra.gmra.mrb[30].mxu1 %v2804_v54  ;;  %v3681_v54 = vld [vmem:[%s5104_s29 + $0x118] sm:$0x3]  ;;  %v2508_v0 = vsel %vm328_vm0, %v2501_v45, %v2507_v59 }
  0xdb   : > { %4789 = vmatpush3.bf16.msra.mxu1 %v6485_v42  ;;  %2977 = vmatprep.mubr.f32.mxu1 %v2814_v44  ;;  %v3684_v44 = vld [vmem:[%s5104_s29 + $0x130] sm:$0xfc]  ;;  %v2830_v62 = vrot.slane %v3681_v54, 2  ;;  %s214_s29 = smul.u32 3, %s4959_s17 }
  0xdc   : > { %4788 = vmatprep.subr.bf16.mxu1 %v6509_v60  ;;  %2655 = vmatmul.mubr.f32.gmra.mrb[68].mxu0 %v2496_v11  ;;  %v2838_v14 = vrot.slane %v3684_v44, 2  ;;  %s4894_s17 = smul.u32 12, %s6632_s18 }
  0xdd   : > { %2659 = vmatprep.mubr.f32.mxu0 %v2506_v16  ;;  %v2831_v8 = vsel %vm867_vm2, %v2824_v50, %v2830_v62  ;;  %p217_p6 = scmp.lt.s32.totalorder %s214_s29, 5 }
  0xde   : > { %2978 = vmatmul.mubr.f32.gmra.mrb[32].mxu1 %v2812_v15  ;;  %v2815_v15 = vrot.slane %v3675_v6, 2  ;;  %v2840_v17 = vsel %vm867_vm2, %v2838_v14, %v2839_v26 }
  0xdf   : > { %2982 = vmatprep.mubr.f32.mxu1 %v2822_v57  ;;  %4790 = vmatpush3.bf16.msra.mxu1 %v6509_v60  ;;  %v2845_v57 = vrot.slane %v3687_v4, 2  ;;  %s6634_s29 = smov (!%p217_p6, %s214_s29), 5 }
  0xe0   : > { %2660 = vmatmul.mubr.f32.gmra.mrb[70].mxu0 %v2504_v30  ;;  %s3256_s30 = sshll.u32 %s6634_s29, 1 }
  0xe1   : > { %4401 = vmatprep.mubr.msk.f32.mxu0 %vm423_vm1, %v2472_v19  ;;  %v2846_v9 = vsel %vm867_vm2, %v2839_v26, %v2845_v57  ;;  %s221_s8 = sadd.s32 %s4894_s17, %s3256_s30 }
  0xe2   : > { %2983 = vmatmul.mubr.f32.gmra.mrb[34].mxu1 %v2819_v20  ;;  %s3257_s18 = sshll.u32 %s221_s8, 3 }
  0xe3   : > { %2987 = vmatprep.mubr.f32.mxu1 %v2829_v21  ;;  %s223_s10 = scalar_lea.vmem %s6620_s4, %s3257_s18 }
  0xe4   : > { %4402 = vmatmul.mubr.msk.f32.vlgmr.msra.gmra.mrb[72].mxu0 %vm423_vm1, %v2478_v28 }
  0xe5   : > { %4782 = vmatpush3.bf16.msra.mxu0 %v6485_v42  ;;  %4404 = vmatprep.mubr.msk.f32.mxu0 %vm423_vm1, %v2487_v29  ;;  %v2825_v42 = vsel %vm867_vm2, %v2823_v2, %v2824_v50 }
  0xe6   : > { %2988 = vmatmul.mubr.f32.gmra.mrb[36].mxu1 %v2827_v5  ;;  %4784 = vmatprep.subr.bf16.mxu0 %v6509_v60 }
  0xe7   : > { %2992 = vmatprep.mubr.f32.mxu1 %v2837_v25 }
  0xe8   : > { %4405 = vmatmul.mubr.msk.f32.gmra.mrb[74].mxu0 %vm423_vm1, %v2493_v31 }
  0xe9   : > { %4407 = vmatprep.mubr.msk.f32.mxu0 %vm423_vm1, %v2502_v56  ;;  %4786 = vmatpush3.bf16.msra.mxu0 %v6509_v60  ;;  %v2816_v60 = vsel %vm867_vm2, %v6188_v46, %v2815_v15 }
  0xea   : > { %2993 = vmatmul.mubr.f32.gmra.mrb[38].mxu1 %v2834_v52 }
  0xeb   : > { %2997 = vmatprep.mubr.f32.mxu1 %v2844_v48 }
  0xec   : > { %4408 = vmatmul.mubr.msk.f32.gmra.mrb[76].mxu0 %vm423_vm1, %v2508_v0 }
  0xed   : > { %4418 = vmatprep.mubr.msk.f32.mxu0 %vm423_vm1, %v2810_v1 }
  0xee   : > { %2998 = vmatmul.mubr.f32.gmra.mrb[40].mxu1 %v2842_v61 }
  0xef   : > { %4421 = vmatprep.mubr.msk.f32.mxu1 %vm423_vm1, %v2825_v42 }
  0xf0   : > { %4419 = vmatmul.mubr.msk.f32.vlgmr.msra.gmra.mrb[72].mxu0 %vm423_vm1, %v2816_v60 }
  0xf2   : > { %4422 = vmatmul.mubr.msk.f32.vlgmr.msra.gmra.mrb[42].mxu1 %vm423_vm1, %v2831_v8 }
  0xf3   : > { %4424 = vmatprep.mubr.msk.f32.mxu1 %vm423_vm1, %v2840_v17 }
  0xf6   : > { %4425 = vmatmul.mubr.msk.f32.gmra.mrb[44].mxu1 %vm423_vm1, %v2846_v9 }
  0xff   : > { %v3766_v10 = vpop.f32.mrb[0].mxu0 }
 0x100   : > { %v3767_v11 = vpop.f32.mrb[1].mxu0 }
 0x101   : > { %v3768_v13 = vadd.f32 %v3767_v11, %v3766_v10 }
 0x103   : > { %v3769_v40 = vpop.f32.mrb[2].mxu0 }
 0x104   : > { %v3770_v16 = vpop.f32.mrb[3].mxu0 }
 0x105   : > { %v3771_v18 = vadd.f32 %v3770_v16, %v3769_v40 }
 0x107   : > { %v3772_v47 = vpop.f32.mrb[4].mxu0 }
 0x108   : > { %v3773_v20 = vpop.f32.mrb[5].mxu0 }
 0x109   : > { %v3774_v46 = vadd.f32 %v3773_v20, %v3772_v47  ;;  %s4896_s7 = spop %4895 }
 0x10b   : > { %v3775_v21 = vpop.f32.mrb[6].mxu0 }
 0x10c   : > { %v3776_v24 = vpop.f32.mrb[7].mxu0 }
 0x10d   : > { %v3826_v43 = vpop.f32.mrb[6].mxu1  ;;  %v3777_v30 = vadd.f32 %v3776_v24, %v3775_v21 }
 0x10e   : > { %v3827_v22 = vpop.f32.mrb[7].mxu1 }
 0x10f   : > { %v3828_v23 = vadd.f32 %v3827_v22, %v3826_v43  ;;  %v3778_v19 = vpop.f32.mrb[8].mxu0 }
 0x110   : > { %v3779_v35 = vpop.f32.mrb[9].mxu0 }
 0x111   : > { %v4801_v33 = vadd.f32 %v3828_v23, %v3768_v13  ;;  %v3829_v27 = vpop.f32.mrb[8].mxu1  ;;  %v3780_v5 = vadd.f32 %v3779_v35, %v3778_v19 }
 0x112   : > { %v3830_v32 = vpop.f32.mrb[9].mxu1 }
 0x113   : > { %v3831_v34 = vadd.f32 %v3830_v32, %v3829_v27  ;;  %v3781_v39 = vpop.f32.mrb[10].mxu0 }
 0x114   : > { %v3782_v25 = vpop.f32.mrb[11].mxu0 }
 0x115   : > { %v4791_v38 = vadd.f32 %v3831_v34, %v3771_v18  ;;  %v3832_v12 = vpop.f32.mrb[10].mxu1  ;;  %v3783_v28 = vadd.f32 %v3782_v25, %v3781_v39 }
 0x116   : > { %v3833_v37 = vpop.f32.mrb[11].mxu1 }
 0x117   : > { %v3834_v55 = vadd.f32 %v3833_v37, %v3832_v12 }
 0x119   : > { %v4822_v36 = vadd.f32 %v3834_v55, %v3774_v46  ;;  %v3835_v58 = vpop.f32.mrb[12].mxu1 }
 0x11a   : > { %v3836_v3 = vpop.f32.mrb[13].mxu1 }
 0x11b   : > { %v3837_v29 = vadd.f32 %v3836_v3, %v3835_v58 }
 0x11d   : > { %v4811_v49 = vadd.f32 %v3837_v29, %v3777_v30  ;;  %v3838_v45 = vpop.f32.mrb[14].mxu1 }
 0x11e   : > { %v3839_v7 = vpop.f32.mrb[15].mxu1 }
 0x11f   : > { %v3840_v52 = vadd.f32 %v3839_v7, %v3838_v45  ;;  %v3886_v50 = vpop.f32.mrb[12].mxu0 }
 0x120   : > { %v3887_v54 = vpop.f32.mrb[13].mxu0 }
 0x121   : > { %v4844_v53 = vadd.f32 %v3840_v52, %v3780_v5  ;;  %v3841_v41 = vpop.f32.mrb[16].mxu1  ;;  %v3888_v59 = vadd.f32 %v3887_v54, %v3886_v50 }
 0x122   : > { %v3842_v48 = vpop.f32.mrb[17].mxu1 }
 0x123   : > { %v3843_v2 = vadd.f32 %v3842_v48, %v3841_v41  ;;  %v4802_v44 = vadd.f32 %v4801_v33, %v3888_v59  ;;  %v3889_v56 = vpop.f32.mrb[14].mxu0 }
 0x124   : > { %v3890_v63 = vpop.f32.mrb[15].mxu0 }
 0x125   : > { %v4833_v31 = vadd.f32 %v3843_v2, %v3783_v28  ;;  %v3891_v6 = vadd.f32 %v3890_v63, %v3889_v56 }
 0x127   : > { %v4792_v61 = vadd.f32 %v4791_v38, %v3891_v6  ;;  %v3892_v62 = vpop.f32.mrb[16].mxu0 }
 0x128   : > { %v3893_v42 = vpop.f32.mrb[17].mxu0 }
 0x129   : > { %v3894_v14 = vadd.f32 %v3893_v42, %v3892_v62 }
 0x12b   : > { %v4823_v26 = vadd.f32 %v4822_v36, %v3894_v14  ;;  %v3895_v4 = vpop.f32.mrb[18].mxu0 }
 0x12c   : > { %v3896_v0 = vpop.f32.mrb[19].mxu0 }
 0x12d   : > { %v3897_v15 = vadd.f32 %v3896_v0, %v3895_v4 }
 0x12f   : > { %v4812_v1 = vadd.f32 %v4811_v49, %v3897_v15  ;;  %v3898_v8 = vpop.f32.mrb[20].mxu0 }
 0x130   : > { %v3899_v57 = vpop.f32.mrb[21].mxu0 }
 0x131   : > { %v3900_v17 = vadd.f32 %v3899_v57, %v3898_v8 }
 0x133   : > { %v4845_v60 = vadd.f32 %v4844_v53, %v3900_v17  ;;  %v3901_v9 = vpop.f32.mrb[22].mxu0 }
 0x134   : > { %v3902_v10 = vpop.f32.mrb[23].mxu0 }
 0x135   : > { %v3903_v11 = vadd.f32 %v3902_v10, %v3901_v9 }
 0x137   : > { %v4834_v13 = vadd.f32 %v4833_v31, %v3903_v11 }
 0x13f   : > { %v3946_v40 = vpop.f32.mrb[24].mxu0 }
 0x140   : > { %v3947_v16 = vpop.f32.mrb[25].mxu0 }
 0x141   : > { %v3948_v18 = vadd.f32 %v3947_v16, %v3946_v40 }
 0x143   : > { %v4803_v47 = vadd.f32 %v4802_v44, %v3948_v18  ;;  %v3949_v20 = vpop.f32.mrb[26].mxu0 }
 0x144   : > { %v3950_v43 = vpop.f32.mrb[27].mxu0 }
 0x145   : > { %v3951_v46 = vadd.f32 %v3950_v43, %v3949_v20 }
 0x147   : > { %v4793_v22 = vadd.f32 %v4792_v61, %v3951_v46  ;;  %v3952_v23 = vpop.f32.mrb[28].mxu0 }
 0x148   : > { %v3953_v21 = vpop.f32.mrb[29].mxu0 }
 0x149   : > { %v3954_v24 = vadd.f32 %v3953_v21, %v3952_v23 }
 0x14b   : > { %v4824_v33 = vadd.f32 %v4823_v26, %v3954_v24  ;;  %v3955_v27 = vpop.f32.mrb[30].mxu0 }
 0x14c   : > { %v3956_v30 = vpop.f32.mrb[31].mxu0 }
 0x14d   : > { %v3957_v32 = vadd.f32 %v3956_v30, %v3955_v27 }
 0x14f   : > { %v4813_v34 = vadd.f32 %v4812_v1, %v3957_v32  ;;  %v3958_v19 = vpop.f32.mrb[32].mxu0 }
 0x150   : > { %v3959_v35 = vpop.f32.mrb[33].mxu0 }
 0x151   : > { %v3960_v38 = vadd.f32 %v3959_v35, %v3958_v19 }
 0x153   : > { %v4846_v12 = vadd.f32 %v4845_v60, %v3960_v38  ;;  %v3961_v5 = vpop.f32.mrb[34].mxu0 }
 0x154   : > { %v3962_v37 = vpop.f32.mrb[35].mxu0 }
 0x155   : > { %v3963_v55 = vadd.f32 %v3962_v37, %v3961_v5 }
 0x157   : > { %v4835_v39 = vadd.f32 %v4834_v13, %v3963_v55 }
 0x15d   : > { %v4006_v25 = vpop.f32.mrb[18].mxu1 }
 0x15e   : > { %v4007_v36 = vpop.f32.mrb[19].mxu1 }
 0x15f   : > { %v4008_v58 = vadd.f32 %v4007_v36, %v4006_v25  ;;  %v4066_v49 = vpop.f32.mrb[36].mxu0 }
 0x160   : > { %v4067_v45 = vpop.f32.mrb[37].mxu0 }
 0x161   : > { %v4804_v28 = vadd.f32 %v4803_v47, %v4008_v58  ;;  %v4009_v51 = vpop.f32.mrb[20].mxu1  ;;  %v4068_v53 = vadd.f32 %v4067_v45, %v4066_v49 }
 0x162   : > { %v4010_v3 = vpop.f32.mrb[21].mxu1 }
 0x163   : > { %v4011_v29 = vadd.f32 %v4010_v3, %v4009_v51  ;;  %v4805_v2 = vadd.f32 %v4804_v28, %v4068_v53  ;;  %v4069_v50 = vpop.f32.mrb[38].mxu0 }
 0x164   : > { %v4070_v54 = vpop.f32.mrb[39].mxu0 }
 0x165   : > { %v4794_v7 = vadd.f32 %v4793_v22, %v4011_v29  ;;  %v4012_v52 = vpop.f32.mrb[22].mxu1  ;;  %v4071_v44 = vadd.f32 %v4070_v54, %v4069_v50 }
 0x166   : > { %v4013_v41 = vpop.f32.mrb[23].mxu1 }
 0x167   : > { %v4014_v48 = vadd.f32 %v4013_v41, %v4012_v52  ;;  %v4795_v6 = vadd.f32 %v4794_v7, %v4071_v44  ;;  %v4072_v61 = vpop.f32.mrb[40].mxu0 }
 0x168   : > { %v4073_v62 = vpop.f32.mrb[41].mxu0 }
 0x169   : > { %v4825_v31 = vadd.f32 %v4824_v33, %v4014_v48  ;;  %v4015_v59 = vpop.f32.mrb[24].mxu1  ;;  %v4074_v26 = vadd.f32 %v4073_v62, %v4072_v61 }
 0x16a   : > { %v4016_v56 = vpop.f32.mrb[25].mxu1 }
 0x16b   : > { %v4017_v63 = vadd.f32 %v4016_v56, %v4015_v59  ;;  %v4826_v15 = vadd.f32 %v4825_v31, %v4074_v26  ;;  %v4075_v1 = vpop.f32.mrb[42].mxu0 }
 0x16c   : > { %v4076_v8 = vpop.f32.mrb[43].mxu0 }
 0x16d   : > { %v4814_v42 = vadd.f32 %v4813_v34, %v4017_v63  ;;  %v4018_v14 = vpop.f32.mrb[26].mxu1  ;;  %v4077_v60 = vadd.f32 %v4076_v8, %v4075_v1 }
 0x16e   : > { %v4019_v4 = vpop.f32.mrb[27].mxu1 }
 0x16f   : > { %v4020_v0 = vadd.f32 %v4019_v4, %v4018_v14  ;;  %v4815_v11 = vadd.f32 %v4814_v42, %v4077_v60  ;;  %v4078_v13 = vpop.f32.mrb[44].mxu0 }
 0x170   : > { %v4079_v40 = vpop.f32.mrb[45].mxu0 }
 0x171   : > { %v4847_v57 = vadd.f32 %v4846_v12, %v4020_v0  ;;  %v4021_v17 = vpop.f32.mrb[28].mxu1  ;;  %v4080_v18 = vadd.f32 %v4079_v40, %v4078_v13 }
 0x172   : > { %v4022_v9 = vpop.f32.mrb[29].mxu1 }
 0x173   : > { %v4023_v10 = vadd.f32 %v4022_v9, %v4021_v17  ;;  %v4848_v47 = vadd.f32 %v4847_v57, %v4080_v18  ;;  %v4081_v20 = vpop.f32.mrb[46].mxu0 }
 0x174   : > { %v4082_v43 = vpop.f32.mrb[47].mxu0 }
 0x175   : > { %v4836_v16 = vadd.f32 %v4835_v39, %v4023_v10  ;;  %v4083_v46 = vadd.f32 %v4082_v43, %v4081_v20 }
 0x177   : > { %v4837_v22 = vadd.f32 %v4836_v16, %v4083_v46 }
 0x17f   : > { %v4126_v23 = vpop.f32.mrb[48].mxu0 }
 0x180   : > { %v4127_v21 = vpop.f32.mrb[49].mxu0 }
 0x181   : > { %v4128_v24 = vadd.f32 %v4127_v21, %v4126_v23 }
 0x183   : > { %v4129_v33 = vpop.f32.mrb[50].mxu0  ;;  %v4806_v27 = vadd.f32 %v4805_v2, %v4128_v24 }
 0x184   : > { %v4130_v30 = vpop.f32.mrb[51].mxu0 }
 0x185   : > { %v4131_v32 = vadd.f32 %v4130_v30, %v4129_v33 }
 0x187   : > { %v4132_v34 = vpop.f32.mrb[52].mxu0  ;;  %v4796_v19 = vadd.f32 %v4795_v6, %v4131_v32 }
 0x188   : > { %v4133_v35 = vpop.f32.mrb[53].mxu0 }
 0x189   : > { %v4134_v12 = vadd.f32 %v4133_v35, %v4132_v34 }
 0x18b   : > { %v4135_v39 = vpop.f32.mrb[54].mxu0  ;;  %v4827_v25 = vadd.f32 %v4826_v15, %v4134_v12 }
 0x18c   : > { %v4136_v36 = vpop.f32.mrb[55].mxu0 }
 0x18d   : > { %v4386_v38 = vpop.f32.mrb[0].mxu1  ;;  %v4137_v28 = vadd.f32 %v4136_v36, %v4135_v39 }
 0x18e   : > { %v4797_v5 = vadd.f32 %v4796_v19, %v4386_v38  ;;  %v2375_v37 = vpop.f32.mrb[1].mxu1 }
 0x18f   : > { %v4807_v55 = vadd.f32 %v4806_v27, %v2375_v37  ;;  %v4816_v3 = vadd.f32 %v4815_v11, %v4137_v28  ;;  %v4138_v49 = vpop.f32.mrb[56].mxu0 }
 0x190   : > { %v4139_v45 = vpop.f32.mrb[57].mxu0 }
 0x191   : > { %v4389_v58 = vpop.f32.mrb[2].mxu1  ;;  %v4140_v52 = vadd.f32 %v4139_v45, %v4138_v49 }
 0x192   : > { %v2385_v51 = vpop.f32.mrb[3].mxu1  ;;  %v4817_v53 = vadd.f32 %v4816_v3, %v4389_v58 }
 0x193   : > { %v4828_v29 = vadd.f32 %v4827_v25, %v2385_v51  ;;  %v4849_v48 = vadd.f32 %v4848_v47, %v4140_v52  ;;  %v4141_v2 = vpop.f32.mrb[58].mxu0  ;;  %v3730_v52 = vld [vmem:[%s6618_s2] ss:$0 sm:$0xff] }
 0x194   : > { %v4142_v50 = vpop.f32.mrb[59].mxu0 }
 0x195   : > { %v4392_v7 = vpop.f32.mrb[4].mxu1  ;;  %v4143_v31 = vadd.f32 %v4142_v50, %v4141_v2 }
 0x196   : > { %v2395_v41 = vpop.f32.mrb[5].mxu1 }
 0x197   : > { %v4850_v54 = vadd.f32 %v4849_v48, %v2395_v41  ;;  %v4838_v59 = vadd.f32 %v4837_v22, %v4143_v31 }
 0x199   : > { %v4839_v44 = vadd.f32 %v4838_v59, %v4392_v7 }
 0x19f   : > { %v4186_v56 = vpop.f32.mrb[60].mxu0 }
 0x1a0   : > { %v4187_v63 = vpop.f32.mrb[61].mxu0 }
 0x1a1   : > { %v4188_v6 = vadd.f32 %v4187_v63, %v4186_v56 }
 0x1a3   : > { %v4808_v61 = vadd.f32 %v4807_v55, %v4188_v6  ;;  %v4189_v62 = vpop.f32.mrb[62].mxu0 }
 0x1a4   : > { %v4190_v42 = vpop.f32.mrb[63].mxu0 }
 0x1a5   : > { %v4191_v14 = vadd.f32 %v4190_v42, %v4189_v62  ;;  %v3131_v62 = vstv %s4896_s7 }
 0x1a7   : > { %v4798_v26 = vadd.f32 %v4797_v5, %v4191_v14  ;;  %v4192_v4 = vpop.f32.mrb[64].mxu0 }
 0x1a8   : > { %v4193_v0 = vpop.f32.mrb[65].mxu0 }
 0x1a9   : > { %v4194_v1 = vadd.f32 %v4193_v0, %v4192_v4 }
 0x1ab   : > { %v4195_v17 = vpop.f32.mrb[66].mxu0  ;;  %v4829_v60 = vadd.f32 %v4828_v29, %v4194_v1 }
 0x1ac   : > { %v4196_v9 = vpop.f32.mrb[67].mxu0 }
 0x1ad   : > { %v4246_v15 = vpop.f32.mrb[30].mxu1  ;;  %v4197_v11 = vadd.f32 %v4196_v9, %v4195_v17 }
 0x1ae   : > { %v4247_v8 = vpop.f32.mrb[31].mxu1 }
 0x1af   : > { %v4248_v57 = vadd.f32 %v4247_v8, %v4246_v15  ;;  %v4198_v18 = vpop.f32.mrb[68].mxu0  ;;  %v4818_v47 = vadd.f32 %v4817_v53, %v4197_v11 }
 0x1b0   : > { %v4199_v20 = vpop.f32.mrb[69].mxu0 }
 0x1b1   : > { %v4249_v10 = vpop.f32.mrb[32].mxu1  ;;  %v4809_v13 = vadd.f32 %v4808_v61, %v4248_v57  ;;  %v4200_v46 = vadd.f32 %v4199_v20, %v4198_v18 }
 0x1b2   : > { %v4250_v40 = vpop.f32.mrb[33].mxu1 }
 0x1b3   : > { %v4251_v16 = vadd.f32 %v4250_v40, %v4249_v10  ;;  %v4201_v24 = vpop.f32.mrb[70].mxu0  ;;  %v4851_v33 = vadd.f32 %v4850_v54, %v4200_v46 }
 0x1b4   : > { %v4202_v27 = vpop.f32.mrb[71].mxu0 }
 0x1b5   : > { %v4252_v43 = vpop.f32.mrb[34].mxu1  ;;  %v4799_v22 = vadd.f32 %v4798_v26, %v4251_v16  ;;  %v4203_v32 = vadd.f32 %v4202_v27, %v4201_v24 }
 0x1b6   : > { %v4253_v23 = vpop.f32.mrb[35].mxu1 }
 0x1b7   : > { %v4254_v21 = vadd.f32 %v4253_v23, %v4252_v43  ;;  %v4840_v35 = vadd.f32 %v4839_v44, %v4203_v32 }
 0x1b9   : > { %v4255_v30 = vpop.f32.mrb[36].mxu1 }
 0x1ba   : > { %v4256_v34 = vpop.f32.mrb[37].mxu1 }
 0x1bb   : > { %v4257_v19 = vadd.f32 %v4256_v34, %v4255_v30  ;;  %v4406_v37 = vpop.f32.mrb[74].mxu0 }
 0x1bc   : > { %v4819_v55 = vadd.f32 %v4818_v47, %v4406_v37  ;;  %v2741_v39 = vpop.f32.mrb[75].mxu0 }
 0x1bd   : > { %v4258_v38 = vpop.f32.mrb[38].mxu1  ;;  %v4830_v36 = vadd.f32 %v4829_v60, %v2741_v39 }
 0x1be   : > { %v4259_v12 = vpop.f32.mrb[39].mxu1  ;;  %v4820_v28 = vadd.f32 %v4819_v55, %v4257_v19 }
 0x1bf   : > { %v4260_v5 = vadd.f32 %v4259_v12, %v4258_v38  ;;  %v4409_v3 = vpop.f32.mrb[76].mxu0  ;;  %v4831_v29 = vadd.f32 %v4830_v36, %v4254_v21 }
 0x1c0   : > { %v4841_v49 = vadd.f32 %v4840_v35, %v4409_v3  ;;  %v2751_v45 = vpop.f32.mrb[77].mxu0 }
 0x1c1   : > { %v4261_v25 = vpop.f32.mrb[40].mxu1  ;;  %v4852_v53 = vadd.f32 %v4851_v33, %v2751_v45 }
 0x1c2   : > { %v4262_v58 = vpop.f32.mrb[41].mxu1 }
 0x1c3   : > { %v4263_v51 = vadd.f32 %v4262_v58, %v4261_v25  ;;  %v4420_v54 = vpop.f32.mrb[72].mxu0  ;;  %v4853_v31 = vadd.f32 %v4852_v53, %v4260_v5 }
 0x1c4   : > { %v4800_v44 = vadd.f32 %v4799_v22, %v4420_v54  ;;  %v3069_v56 = vpop.f32.mrb[73].mxu0 }
 0x1c5   : > { %v4423_v7 = vpop.f32.mrb[42].mxu1  ;;  %v4842_v2 = vadd.f32 %v4841_v49, %v4263_v51  ;;  %v4810_v61 = vadd.f32 %v4809_v13, %v3069_v56 }
 0x1c6   : > { %v4821_v41 = vadd.f32 %v4820_v28, %v4423_v7  ;;  %v3079_v48 = vpop.f32.mrb[43].mxu1  ;;  %v3112_v14 = vadd.f32 %v4800_v44, %v3730_v52 }
 0x1c7   : > { %v4832_v50 = vadd.f32 %v4831_v29, %v3079_v48  ;;  %v3111_v15 = vadd.f32 %v4810_v61, %v3730_v52 }
 0x1c8   : > { %v3114_v59 = vadd.f32 %v4821_v41, %v3730_v52  ;;  %v3126_v57 = vmin.f32 %v3112_v14, 0.0  ;;  %v3120_v40 = vmax.f32 %v3112_v14, 0.0 }
 0x1c9   : > { %v3113_v63 = vadd.f32 %v4832_v50, %v3730_v52  ;;  %v4426_v6 = vpop.f32.mrb[44].mxu1  ;;  %v3125_v10 = vmin.f32 %v3111_v15, 0.0  ;;  %v3119_v20 = vmax.f32 %v3111_v15, 0.0 }
 0x1ca   : > { %v3128_v42 = vmin.f32 %v3114_v59, 0.0  ;;  %v4843_v26 = vadd.f32 %v4842_v2, %v4426_v6  ;;  %v3089_v4 = vpop.f32.mrb[45].mxu1  ;;  %v3122_v8 = vmax.f32 %v3114_v59, 0.0  ;;  %v3133_v18 = vmul.f32 %v3131_v62, %v3126_v57 }
 0x1cb   : > { %v3127_v0 = vmin.f32 %v3113_v63, 0.0  ;;  %v4854_v1 = vadd.f32 %v4853_v31, %v3089_v4  ;;  %v3121_v9 = vmax.f32 %v3113_v63, 0.0  ;;  %v3132_v46 = vmul.f32 %v3131_v62, %v3125_v10 }
 0x1cc   : > { %v3116_v17 = vadd.f32 %v4843_v26, %v3730_v52  ;;  %v3135_v60 = vmul.f32 %v3131_v62, %v3128_v42  ;;  %v3139_v24 = vadd.f32 %v3133_v18, %v3120_v40 }
 0x1cd   : > { %v3115_v11 = vadd.f32 %v4854_v1, %v3730_v52  ;;  %v3134_v13 = vmul.f32 %v3131_v62, %v3127_v0  ;;  %v3138_v30 = vadd.f32 %v3132_v46, %v3119_v20 }
 0x1ce   : > { %v3130_v16 = vmin.f32 %v3116_v17, 0.0  ;;  %v3141_v47 = vadd.f32 %v3135_v60, %v3122_v8  ;;  %v3124_v23 = vmax.f32 %v3116_v17, 0.0  ;;  %3145 = vst [vmem:[%s223_s10 + $0x8] sm:$0xff] %v3139_v24 }
 0x1cf   : > { %v3129_v43 = vmin.f32 %v3115_v11, 0.0  ;;  %v3140_v22 = vadd.f32 %v3134_v13, %v3121_v9  ;;  %v3123_v33 = vmax.f32 %v3115_v11, 0.0  ;;  %3144 = vst [vmem:[%s223_s10] sm:$0xff] %v3138_v30 }
 0x1d0   : > { %v3137_v21 = vmul.f32 %v3131_v62, %v3130_v16  ;;  %3147 = vst [vmem:[%s223_s10 + $0x18] sm:$0xff] %v3141_v47 }
 0x1d1   : > { %v3136_v27 = vmul.f32 %v3131_v62, %v3129_v43  ;;  %3146 = vst [vmem:[%s223_s10 + $0x10] sm:$0xff] %v3140_v22 }
 0x1d2   : > { %v3143_v32 = vadd.f32 %v3137_v21, %v3124_v23 }
 0x1d3   : > { %v3142_v34 = vadd.f32 %v3136_v27, %v3123_v33 }
 0x1d4   : > { %3149 = vst [vmem:[%s223_s10 + $0x28] sm:$0xff] %v3143_v32 }
 0x1d5   : > { %3148 = vst [vmem:[%s223_s10 + $0x20] sm:$0xff] %v3142_v34 }
 0x1d6 PF: > { %s16_s21 = sadd.s32 1, %s4975_s21   ;;  %s6621_s17 = smov %s4967_s19 }
 0x1d7   : > { %p13_p7 = scmp.ge.s32.totalorder %s16_s21, 6   ;;  %s6622_s18 = smov %s4971_s20 }
 0x1d8   : > { %s6623_s19 = smov %s6626_s3  ;;  %s6624_s20 = smov %s6630_s22 }
 0x1d9   :  { %15 = sbr.rel (!%p13_p7) target bundleno = 3 (0x3), region = 77 }

</bundles_post_ra>
